<compile_context>
chip_gen: v6e
topology: v6e:2x2x1
jax: 0.10.0
libtpu: 0.0.40
codegen_flags: <defaults>
</compile_context>

<pallas_src>
import functools

import jax
import jax.numpy as jnp
from jax.experimental import pallas as pl
from jax.experimental.pallas import tpu as pltpu


# ----------------------- grouping glue (plain JAX) ------------------------- #

def square_distance(src, dst):
    # src [B,N,C], dst [B,M,C] -> [B,N,M]
    d = -2.0 * jnp.einsum("bnc,bmc->bnm", src, dst)
    d = d + jnp.sum(src ** 2, -1)[:, :, None]
    d = d + jnp.sum(dst ** 2, -1)[:, None, :]
    return d


def index_points(points, idx):
    # points [B,N,C], idx [B,...] -> [B,...,C]
    return jax.vmap(lambda p, i: p[i])(points, idx)


def farthest_point_sample(xyz, npoint):
    # TODO(synk): torch uses a random initial farthest point (torch.randint);
    # here we start deterministically at index 0.
    B, N, _ = xyz.shape
    distance = jnp.full((B, N), 1e10, dtype=xyz.dtype)
    farthest = jnp.zeros((B,), dtype=jnp.int32)
    batch_idx = jnp.arange(B)

    def body(carry, _):
        dist_acc, far = carry
        centroid = xyz[batch_idx, far][:, None, :]             # [B,1,3]
        dist = jnp.sum((xyz - centroid) ** 2, -1)               # [B,N]
        dist_acc = jnp.minimum(dist_acc, dist)
        new_far = jnp.argmax(dist_acc, -1).astype(jnp.int32)
        return (dist_acc, new_far), far

    (_, _), cent = jax.lax.scan(body, (distance, farthest), None, length=npoint)
    return cent.T                                               # [B, npoint]


def query_ball_point(radius, nsample, xyz, new_xyz):
    B, N, _ = xyz.shape
    S = new_xyz.shape[1]
    sqrdists = square_distance(new_xyz, xyz)                    # [B,S,N]
    group_idx = jnp.broadcast_to(jnp.arange(N, dtype=jnp.int32), (B, S, N))
    group_idx = jnp.where(sqrdists > radius ** 2, N, group_idx)
    group_idx = jnp.sort(group_idx, axis=-1)[:, :, :nsample]
    group_first = group_idx[:, :, 0:1]
    group_idx = jnp.where(group_idx == N, group_first, group_idx)
    return group_idx


# ------------------------------ tiling policy ------------------------------ #

_VMEM_LIMIT_BYTES = 48 * 1024 * 1024      # safe ceiling on v7x (64 MiB phys)


def _round_up(x, m):
    return ((x + m - 1) // m) * m


def _choose_tbs(BS, K, target_rows=8192, min_grid=8):
    """Groups (lanes) per grid step.

    Lane-aligned (multiple of 128), ~target_rows points (tbs*K) of MXU work
    per step, shrunk until the 1-D "parallel" grid has >= min_grid steps when
    possible so both v7x TensorCores get several pipelined steps each.
    Per-step VMEM footprint stays tiny (<= ~1 MiB), so rows-per-step is the
    only real knob.
    """
    if BS <= 128:
        return BS                               # single full-width block
    tbs = _round_up(max(1, target_rows // K), 128)
    tbs = min(tbs, _round_up(BS, 128))          # no bigger than the problem
    while tbs > 128 and (BS + tbs - 1) // tbs < min_grid:
        tbs -= 128
    return tbs


# -------------------------- Pallas hot-path kernel ------------------------- #

def _mlp_max_kernel(num_layers, K, x_ref, *refs):
    """Per-neighbor MLP (1x1 conv == matmul, BN folded into W) + ReLU, fused
    with the max-over-K reduction.

    x_ref: (K, Cin, tbs) bf16  -- channels on sublanes, groups on lanes.
    out:   (Cout_last, tbs) bf16.
    """
    out_ref = refs[-1]
    params = refs[:-1]
    Ws = [params[2 * l][...] for l in range(num_layers)]        # (Cout_l, Cin_l) bf16
    Ss = [params[2 * l + 1][...] for l in range(num_layers)]    # (Cout_l, 1)   f32
    acc = None
    for k in range(K):                           # static unrolled loop
        h = x_ref[k]                             # (Cin, tbs) bf16 view
        for l in range(num_layers):
            a = jnp.dot(Ws[l], h, preferred_element_type=jnp.float32)  # MXU
            h = jnp.maximum(a + Ss[l], 0.0).astype(jnp.bfloat16)       # f32 epi
        acc = h if acc is None else jnp.maximum(acc, h)          # VPU max
    out_ref[...] = acc                            # lane-dense bf16 store


def pointnet_mlp_max(g, wTs, shifts):
    """g: (K, Cin, B*S) bf16. Returns (Cout_last, B*S) bf16."""
    K, Cin, BS = g.shape
    num_layers = len(wTs)
    cout = wTs[-1].shape[0]

    tbs = _choose_tbs(BS, K)
    BS_pad = _round_up(BS, tbs)
    if BS_pad != BS:
        # padded (zero) groups produce garbage columns that are sliced off
        g = jnp.pad(g, ((0, 0), (0, 0), (0, BS_pad - BS)))
    grid = BS_pad // tbs

    in_specs = [pl.BlockSpec((K, Cin, tbs), lambda i: (0, 0, i))]
    flat_params = []
    for w, s in zip(wTs, shifts):
        in_specs.append(pl.BlockSpec(w.shape, lambda i: (0, 0)))
        in_specs.append(pl.BlockSpec(s.shape, lambda i: (0, 0)))
        flat_params += [w, s]

    kernel = functools.partial(_mlp_max_kernel, num_layers, K)
    out = pl.pallas_call(
        kernel,
        out_shape=jax.ShapeDtypeStruct((cout, BS_pad), jnp.bfloat16),
        grid_spec=pltpu.PrefetchScalarGridSpec(
            num_scalar_prefetch=0,
            grid=(grid,),
            in_specs=in_specs,
            out_specs=pl.BlockSpec((cout, tbs), lambda i: (0, i)),
        ),
        compiler_params=pltpu.CompilerParams(
            dimension_semantics=("parallel",),
            vmem_limit_bytes=_VMEM_LIMIT_BYTES),
    )(g, *flat_params)
    return out[:, :BS] if BS_pad != BS else out


def _mlp_max_ref(g, wTs, shifts):
    """Pure-JAX reference of the hot path (same bf16/f32 precision pattern)."""
    K = g.shape[0]
    acc = None
    for k in range(K):
        h = g[k]
        for wT, s in zip(wTs, shifts):
            a = jnp.dot(wT, h, preferred_element_type=jnp.float32)
            h = jnp.maximum(a + s, 0.0).astype(jnp.bfloat16)
        acc = h if acc is None else jnp.maximum(acc, h)
    return acc                                    # (Cout_last, B*S) bf16


# ------------------------------ module wrapper ------------------------------ #

class PointNetSetAbstractionMsgPallas:
    """Multi-scale grouping set abstraction (PointNetSetAbstractionMsg)."""

    def __init__(self, npoint, radius_list, nsample_list, in_channel, mlp_list,
                 key):
        self.npoint = npoint
        self.radius_list = list(radius_list)
        self.nsample_list = list(nsample_list)
        self.blocks = []
        # TODO(synk): BatchNorm is applied in eval mode (running stats folded
        # into scale/shift); train-mode batch statistics are not reproduced.
        eps = 1e-5
        for mlp in mlp_list:
            last = in_channel + 3
            wTs, shifts = [], []
            for out_c in mlp:
                key, k1, k2, k3, k4 = jax.random.split(key, 5)
                w = 0.1 * jax.random.normal(k1, (last, out_c), jnp.float32)
                b_conv = 0.1 * jax.random.normal(k2, (out_c,), jnp.float32)
                gamma = 1.0 + 0.1 * jax.random.normal(k3, (out_c,), jnp.float32)
                beta = 0.1 * jax.random.normal(k4, (out_c,), jnp.float32)
                run_mean = jnp.zeros((out_c,), jnp.float32)
                run_var = jnp.ones((out_c,), jnp.float32)
                scale = gamma / jnp.sqrt(run_var + eps)
                shift = beta + scale * (b_conv - run_mean)
                wT = (w * scale[None, :]).T            # fold BN scale; (Cout, Cin)
                wTs.append(wT.astype(jnp.bfloat16))
                shifts.append(shift.reshape(out_c, 1).astype(jnp.float32))
                last = out_c
            self.blocks.append(dict(wTs=wTs, shifts=shifts, cout=mlp[-1]))

    def __call__(self, xyz, points):
        # xyz: [B, 3, N], points: [B, D, N] or None  (PyTorch layout)
        xyz_t = jnp.transpose(xyz, (0, 2, 1))                        # [B,N,3] f32
        pts_t = None if points is None else jnp.transpose(points, (0, 2, 1))
        B, N, _ = xyz_t.shape
        S = self.npoint

        new_xyz = index_points(xyz_t, farthest_point_sample(xyz_t, S))  # [B,S,3]

        # bf16 copies for the (dominant) grouped-feature stream
        xyz_bf = xyz_t.astype(jnp.bfloat16)
        pts_bf = None if pts_t is None else pts_t.astype(jnp.bfloat16)
        new_xyz_bf = new_xyz.astype(jnp.bfloat16)

        outs = []
        for i, radius in enumerate(self.radius_list):
            K = self.nsample_list[i]
            idx = query_ball_point(radius, K, xyz_t, new_xyz)        # [B,S,K]
            grouped_xyz = index_points(xyz_bf, idx) - new_xyz_bf[:, :, None, :]
            if pts_bf is not None:
                grouped = jnp.concatenate([index_points(pts_bf, idx),
                                           grouped_xyz], -1)         # [B,S,K,Cin]
            else:
                grouped = grouped_xyz
            Cin = grouped.shape[-1]
            BS = B * S
            # channels-on-sublanes / groups-on-lanes layout: (K, Cin, B*S)
            g = jnp.transpose(grouped.reshape(BS, K, Cin), (1, 2, 0))
            blk = self.blocks[i]
            feat = pointnet_mlp_max(g, blk["wTs"], blk["shifts"])    # (Cout, BS)
            outs.append(feat.reshape(blk["cout"], B, S))

        new_points = jnp.concatenate(outs, 0)                        # [sumC,B,S]
        new_points_out = jnp.transpose(new_points, (1, 0, 2)).astype(jnp.float32)
        new_xyz_out = jnp.transpose(new_xyz, (0, 2, 1))              # [B,3,S]
        return new_xyz_out, new_points_out


# ------------------------ pure-JAX reference forward ------------------------ #

def _reference_forward(module, xyz, points):
    xyz_t = jnp.transpose(xyz, (0, 2, 1))
    pts_t = None if points is None else jnp.transpose(points, (0, 2, 1))
    B, N, _ = xyz_t.shape
    S = module.npoint
    new_xyz = index_points(xyz_t, farthest_point_sample(xyz_t, S))
    xyz_bf = xyz_t.astype(jnp.bfloat16)
    pts_bf = None if pts_t is None else pts_t.astype(jnp.bfloat16)
    new_xyz_bf = new_xyz.astype(jnp.bfloat16)
    outs = []
    for i, radius in enumerate(module.radius_list):
        K = module.nsample_list[i]
        idx = query_ball_point(radius, K, xyz_t, new_xyz)
        grouped_xyz = index_points(xyz_bf, idx) - new_xyz_bf[:, :, None, :]
        if pts_bf is not None:
            grouped = jnp.concatenate([index_points(pts_bf, idx), grouped_xyz], -1)
        else:
            grouped = grouped_xyz
        Cin = grouped.shape[-1]
        BS = B * S
        g = jnp.transpose(grouped.reshape(BS, K, Cin), (1, 2, 0))
        blk = module.blocks[i]
        feat = _mlp_max_ref(g, blk["wTs"], blk["shifts"])
        outs.append(feat.reshape(blk["cout"], B, S))
    new_points = jnp.transpose(jnp.concatenate(outs, 0), (1, 0, 2)).astype(jnp.float32)
    return jnp.transpose(new_xyz, (0, 2, 1)), new_points


# ---------------------------------- main ----------------------------------- #

if __name__ == "__main__":
    key = jax.random.PRNGKey(0)
    k_xyz, k_pts, k_params = jax.random.split(key, 3)

    B, N, D = 2, 64, 3              # batch, input points, feature channels
    npoint = 16
    radius_list = [0.3, 0.6]
    nsample_list = [8, 16]
    mlp_list = [[16, 32], [32, 64]]

    xyz = jax.random.uniform(k_xyz, (B, 3, N), jnp.float32)      # [B, 3, N]
    points = jax.random.normal(k_pts, (B, D, N), jnp.float32)    # [B, D, N]

    sa = PointNetSetAbstractionMsgPallas(npoint, radius_list, nsample_list,
                                         D, mlp_list, key=k_params)
    fwd = jax.jit(sa.__call__)
    new_xyz, new_points = fwd(xyz, points)
    jax.block_until_ready((new_xyz, new_points))

    assert new_xyz.shape == (B, 3, npoint)
    assert new_points.shape == (B, sum(m[-1] for m in mlp_list), npoint)

    # one-time correctness check against the pure-JAX reference (kept out of
    # the forward path so it cannot hide kernel performance or block jit).
    ref_xyz, ref_points = _reference_forward(sa, xyz, points)
    assert jnp.allclose(new_xyz, ref_xyz, atol=1e-5, rtol=1e-5)
    assert jnp.allclose(new_points, ref_points, atol=1e-2, rtol=1e-2)

    print("KERNEL_OK")
</pallas_src>

<mosaic_0001>
module attributes {stable_mosaic.version = 11 : i64} {
  func.func @_mlp_max_kernel(%arg0: i32, %arg1: memref<8x6x32xbf16, #tpu.memory_space<vmem>>, %arg2: memref<16x6xbf16, #tpu.memory_space<vmem>>, %arg3: memref<16x1xf32, #tpu.memory_space<vmem>>, %arg4: memref<32x16xbf16, #tpu.memory_space<vmem>>, %arg5: memref<32x1xf32, #tpu.memory_space<vmem>>, %arg6: memref<32x32xbf16, #tpu.memory_space<vmem>>) attributes {dimension_semantics = [#tpu.dimension_semantics<parallel>], iteration_bounds = array<i64: 1>, scalar_prefetch = 0 : i64, scratch_operands = 0 : i64, tpu.core_type = #tpu.core_type<tc>, window_params = [{transform_indices = @transform_0, window_bounds = array<i64: 8, 6, 32>}, {pipeline_mode = #tpu.pipeline_mode<synchronous>, transform_indices = @transform_1, window_bounds = array<i64: 16, 6>}, {pipeline_mode = #tpu.pipeline_mode<synchronous>, transform_indices = @transform_2, window_bounds = array<i64: 16, 1>}, {pipeline_mode = #tpu.pipeline_mode<synchronous>, transform_indices = @transform_3, window_bounds = array<i64: 32, 16>}, {pipeline_mode = #tpu.pipeline_mode<synchronous>, transform_indices = @transform_4, window_bounds = array<i64: 32, 1>}, {transform_indices = @transform_5, window_bounds = array<i64: 32, 32>}]} {
    %c0 = arith.constant 0 : index
    %c0_0 = arith.constant 0 : index
    %0 = vector.load %arg2[%c0, %c0_0] : memref<16x6xbf16, #tpu.memory_space<vmem>>, vector<16x6xbf16>
    %c0_1 = arith.constant 0 : index
    %c0_2 = arith.constant 0 : index
    %1 = vector.load %arg4[%c0_1, %c0_2] : memref<32x16xbf16, #tpu.memory_space<vmem>>, vector<32x16xbf16>
    %c0_3 = arith.constant 0 : index
    %c0_4 = arith.constant 0 : index
    %2 = vector.load %arg3[%c0_3, %c0_4] : memref<16x1xf32, #tpu.memory_space<vmem>>, vector<16x1xf32>
    %c0_5 = arith.constant 0 : index
    %c0_6 = arith.constant 0 : index
    %3 = vector.load %arg5[%c0_5, %c0_6] : memref<32x1xf32, #tpu.memory_space<vmem>>, vector<32x1xf32>
    %c0_7 = arith.constant 0 : index
    %c0_8 = arith.constant 0 : index
    %c0_9 = arith.constant 0 : index
    %4 = vector.load %arg1[%c0_7, %c0_8, %c0_9] : memref<8x6x32xbf16, #tpu.memory_space<vmem>>, vector<1x6x32xbf16>
    %5 = vector.shape_cast %4 : vector<1x6x32xbf16> to vector<6x32xbf16>
    %cst = arith.constant dense<0.000000e+00> : vector<16x32xf32>
    %6 = tpu.matmul %0, %5, %cst {dimension_numbers = #tpu.dot_dimension_numbers<[1], [0], [0], [1], [0, 0, 1, 1], [], []>} : vector<16x6xbf16>, vector<6x32xbf16>, vector<16x32xf32> -> vector<16x32xf32>
    %7 = vector.broadcast %2 : vector<16x1xf32> to vector<16x32xf32>
    %8 = arith.addf %6, %7 : vector<16x32xf32>
    %cst_10 = arith.constant 0.000000e+00 : f32
    %9 = vector.broadcast %cst_10 : f32 to vector<16x32xf32>
    %10 = arith.maximumf %8, %9 : vector<16x32xf32>
    %11 = arith.truncf %10 : vector<16x32xf32> to vector<16x32xbf16>
    %cst_11 = arith.constant dense<0.000000e+00> : vector<32x32xf32>
    %12 = tpu.matmul %1, %11, %cst_11 {dimension_numbers = #tpu.dot_dimension_numbers<[1], [0], [0], [1], [0, 0, 1, 1], [], []>} : vector<32x16xbf16>, vector<16x32xbf16>, vector<32x32xf32> -> vector<32x32xf32>
    %13 = vector.broadcast %3 : vector<32x1xf32> to vector<32x32xf32>
    %14 = arith.addf %12, %13 : vector<32x32xf32>
    %cst_12 = arith.constant 0.000000e+00 : f32
    %15 = vector.broadcast %cst_12 : f32 to vector<32x32xf32>
    %16 = arith.maximumf %14, %15 : vector<32x32xf32>
    %17 = arith.truncf %16 : vector<32x32xf32> to vector<32x32xbf16>
    %c1 = arith.constant 1 : index
    %c0_13 = arith.constant 0 : index
    %c0_14 = arith.constant 0 : index
    %18 = vector.load %arg1[%c1, %c0_13, %c0_14] : memref<8x6x32xbf16, #tpu.memory_space<vmem>>, vector<1x6x32xbf16>
    %19 = vector.shape_cast %18 : vector<1x6x32xbf16> to vector<6x32xbf16>
    %cst_15 = arith.constant dense<0.000000e+00> : vector<16x32xf32>
    %20 = tpu.matmul %0, %19, %cst_15 {dimension_numbers = #tpu.dot_dimension_numbers<[1], [0], [0], [1], [0, 0, 1, 1], [], []>} : vector<16x6xbf16>, vector<6x32xbf16>, vector<16x32xf32> -> vector<16x32xf32>
    %21 = vector.broadcast %2 : vector<16x1xf32> to vector<16x32xf32>
    %22 = arith.addf %20, %21 : vector<16x32xf32>
    %cst_16 = arith.constant 0.000000e+00 : f32
    %23 = vector.broadcast %cst_16 : f32 to vector<16x32xf32>
    %24 = arith.maximumf %22, %23 : vector<16x32xf32>
    %25 = arith.truncf %24 : vector<16x32xf32> to vector<16x32xbf16>
    %cst_17 = arith.constant dense<0.000000e+00> : vector<32x32xf32>
    %26 = tpu.matmul %1, %25, %cst_17 {dimension_numbers = #tpu.dot_dimension_numbers<[1], [0], [0], [1], [0, 0, 1, 1], [], []>} : vector<32x16xbf16>, vector<16x32xbf16>, vector<32x32xf32> -> vector<32x32xf32>
    %27 = vector.broadcast %3 : vector<32x1xf32> to vector<32x32xf32>
    %28 = arith.addf %26, %27 : vector<32x32xf32>
    %cst_18 = arith.constant 0.000000e+00 : f32
    %29 = vector.broadcast %cst_18 : f32 to vector<32x32xf32>
    %30 = arith.maximumf %28, %29 : vector<32x32xf32>
    %31 = arith.truncf %30 : vector<32x32xf32> to vector<32x32xbf16>
    %32 = arith.maximumf %17, %31 : vector<32x32xbf16>
    %c2 = arith.constant 2 : index
    %c0_19 = arith.constant 0 : index
    %c0_20 = arith.constant 0 : index
    %33 = vector.load %arg1[%c2, %c0_19, %c0_20] : memref<8x6x32xbf16, #tpu.memory_space<vmem>>, vector<1x6x32xbf16>
    %34 = vector.shape_cast %33 : vector<1x6x32xbf16> to vector<6x32xbf16>
    %cst_21 = arith.constant dense<0.000000e+00> : vector<16x32xf32>
    %35 = tpu.matmul %0, %34, %cst_21 {dimension_numbers = #tpu.dot_dimension_numbers<[1], [0], [0], [1], [0, 0, 1, 1], [], []>} : vector<16x6xbf16>, vector<6x32xbf16>, vector<16x32xf32> -> vector<16x32xf32>
    %36 = vector.broadcast %2 : vector<16x1xf32> to vector<16x32xf32>
    %37 = arith.addf %35, %36 : vector<16x32xf32>
    %cst_22 = arith.constant 0.000000e+00 : f32
    %38 = vector.broadcast %cst_22 : f32 to vector<16x32xf32>
    %39 = arith.maximumf %37, %38 : vector<16x32xf32>
    %40 = arith.truncf %39 : vector<16x32xf32> to vector<16x32xbf16>
    %cst_23 = arith.constant dense<0.000000e+00> : vector<32x32xf32>
    %41 = tpu.matmul %1, %40, %cst_23 {dimension_numbers = #tpu.dot_dimension_numbers<[1], [0], [0], [1], [0, 0, 1, 1], [], []>} : vector<32x16xbf16>, vector<16x32xbf16>, vector<32x32xf32> -> vector<32x32xf32>
    %42 = vector.broadcast %3 : vector<32x1xf32> to vector<32x32xf32>
    %43 = arith.addf %41, %42 : vector<32x32xf32>
    %cst_24 = arith.constant 0.000000e+00 : f32
    %44 = vector.broadcast %cst_24 : f32 to vector<32x32xf32>
    %45 = arith.maximumf %43, %44 : vector<32x32xf32>
    %46 = arith.truncf %45 : vector<32x32xf32> to vector<32x32xbf16>
    %47 = arith.maximumf %32, %46 : vector<32x32xbf16>
    %c3 = arith.constant 3 : index
    %c0_25 = arith.constant 0 : index
    %c0_26 = arith.constant 0 : index
    %48 = vector.load %arg1[%c3, %c0_25, %c0_26] : memref<8x6x32xbf16, #tpu.memory_space<vmem>>, vector<1x6x32xbf16>
    %49 = vector.shape_cast %48 : vector<1x6x32xbf16> to vector<6x32xbf16>
    %cst_27 = arith.constant dense<0.000000e+00> : vector<16x32xf32>
    %50 = tpu.matmul %0, %49, %cst_27 {dimension_numbers = #tpu.dot_dimension_numbers<[1], [0], [0], [1], [0, 0, 1, 1], [], []>} : vector<16x6xbf16>, vector<6x32xbf16>, vector<16x32xf32> -> vector<16x32xf32>
    %51 = vector.broadcast %2 : vector<16x1xf32> to vector<16x32xf32>
    %52 = arith.addf %50, %51 : vector<16x32xf32>
    %cst_28 = arith.constant 0.000000e+00 : f32
    %53 = vector.broadcast %cst_28 : f32 to vector<16x32xf32>
    %54 = arith.maximumf %52, %53 : vector<16x32xf32>
    %55 = arith.truncf %54 : vector<16x32xf32> to vector<16x32xbf16>
    %cst_29 = arith.constant dense<0.000000e+00> : vector<32x32xf32>
    %56 = tpu.matmul %1, %55, %cst_29 {dimension_numbers = #tpu.dot_dimension_numbers<[1], [0], [0], [1], [0, 0, 1, 1], [], []>} : vector<32x16xbf16>, vector<16x32xbf16>, vector<32x32xf32> -> vector<32x32xf32>
    %57 = vector.broadcast %3 : vector<32x1xf32> to vector<32x32xf32>
    %58 = arith.addf %56, %57 : vector<32x32xf32>
    %cst_30 = arith.constant 0.000000e+00 : f32
    %59 = vector.broadcast %cst_30 : f32 to vector<32x32xf32>
    %60 = arith.maximumf %58, %59 : vector<32x32xf32>
    %61 = arith.truncf %60 : vector<32x32xf32> to vector<32x32xbf16>
    %62 = arith.maximumf %47, %61 : vector<32x32xbf16>
    %c4 = arith.constant 4 : index
    %c0_31 = arith.constant 0 : index
    %c0_32 = arith.constant 0 : index
    %63 = vector.load %arg1[%c4, %c0_31, %c0_32] : memref<8x6x32xbf16, #tpu.memory_space<vmem>>, vector<1x6x32xbf16>
    %64 = vector.shape_cast %63 : vector<1x6x32xbf16> to vector<6x32xbf16>
    %cst_33 = arith.constant dense<0.000000e+00> : vector<16x32xf32>
    %65 = tpu.matmul %0, %64, %cst_33 {dimension_numbers = #tpu.dot_dimension_numbers<[1], [0], [0], [1], [0, 0, 1, 1], [], []>} : vector<16x6xbf16>, vector<6x32xbf16>, vector<16x32xf32> -> vector<16x32xf32>
    %66 = vector.broadcast %2 : vector<16x1xf32> to vector<16x32xf32>
    %67 = arith.addf %65, %66 : vector<16x32xf32>
    %cst_34 = arith.constant 0.000000e+00 : f32
    %68 = vector.broadcast %cst_34 : f32 to vector<16x32xf32>
    %69 = arith.maximumf %67, %68 : vector<16x32xf32>
    %70 = arith.truncf %69 : vector<16x32xf32> to vector<16x32xbf16>
    %cst_35 = arith.constant dense<0.000000e+00> : vector<32x32xf32>
    %71 = tpu.matmul %1, %70, %cst_35 {dimension_numbers = #tpu.dot_dimension_numbers<[1], [0], [0], [1], [0, 0, 1, 1], [], []>} : vector<32x16xbf16>, vector<16x32xbf16>, vector<32x32xf32> -> vector<32x32xf32>
    %72 = vector.broadcast %3 : vector<32x1xf32> to vector<32x32xf32>
    %73 = arith.addf %71, %72 : vector<32x32xf32>
    %cst_36 = arith.constant 0.000000e+00 : f32
    %74 = vector.broadcast %cst_36 : f32 to vector<32x32xf32>
    %75 = arith.maximumf %73, %74 : vector<32x32xf32>
    %76 = arith.truncf %75 : vector<32x32xf32> to vector<32x32xbf16>
    %77 = arith.maximumf %62, %76 : vector<32x32xbf16>
    %c5 = arith.constant 5 : index
    %c0_37 = arith.constant 0 : index
    %c0_38 = arith.constant 0 : index
    %78 = vector.load %arg1[%c5, %c0_37, %c0_38] : memref<8x6x32xbf16, #tpu.memory_space<vmem>>, vector<1x6x32xbf16>
    %79 = vector.shape_cast %78 : vector<1x6x32xbf16> to vector<6x32xbf16>
    %cst_39 = arith.constant dense<0.000000e+00> : vector<16x32xf32>
    %80 = tpu.matmul %0, %79, %cst_39 {dimension_numbers = #tpu.dot_dimension_numbers<[1], [0], [0], [1], [0, 0, 1, 1], [], []>} : vector<16x6xbf16>, vector<6x32xbf16>, vector<16x32xf32> -> vector<16x32xf32>
    %81 = vector.broadcast %2 : vector<16x1xf32> to vector<16x32xf32>
    %82 = arith.addf %80, %81 : vector<16x32xf32>
    %cst_40 = arith.constant 0.000000e+00 : f32
    %83 = vector.broadcast %cst_40 : f32 to vector<16x32xf32>
    %84 = arith.maximumf %82, %83 : vector<16x32xf32>
    %85 = arith.truncf %84 : vector<16x32xf32> to vector<16x32xbf16>
    %cst_41 = arith.constant dense<0.000000e+00> : vector<32x32xf32>
    %86 = tpu.matmul %1, %85, %cst_41 {dimension_numbers = #tpu.dot_dimension_numbers<[1], [0], [0], [1], [0, 0, 1, 1], [], []>} : vector<32x16xbf16>, vector<16x32xbf16>, vector<32x32xf32> -> vector<32x32xf32>
    %87 = vector.broadcast %3 : vector<32x1xf32> to vector<32x32xf32>
    %88 = arith.addf %86, %87 : vector<32x32xf32>
    %cst_42 = arith.constant 0.000000e+00 : f32
    %89 = vector.broadcast %cst_42 : f32 to vector<32x32xf32>
    %90 = arith.maximumf %88, %89 : vector<32x32xf32>
    %91 = arith.truncf %90 : vector<32x32xf32> to vector<32x32xbf16>
    %92 = arith.maximumf %77, %91 : vector<32x32xbf16>
    %c6 = arith.constant 6 : index
    %c0_43 = arith.constant 0 : index
    %c0_44 = arith.constant 0 : index
    %93 = vector.load %arg1[%c6, %c0_43, %c0_44] : memref<8x6x32xbf16, #tpu.memory_space<vmem>>, vector<1x6x32xbf16>
    %94 = vector.shape_cast %93 : vector<1x6x32xbf16> to vector<6x32xbf16>
    %cst_45 = arith.constant dense<0.000000e+00> : vector<16x32xf32>
    %95 = tpu.matmul %0, %94, %cst_45 {dimension_numbers = #tpu.dot_dimension_numbers<[1], [0], [0], [1], [0, 0, 1, 1], [], []>} : vector<16x6xbf16>, vector<6x32xbf16>, vector<16x32xf32> -> vector<16x32xf32>
    %96 = vector.broadcast %2 : vector<16x1xf32> to vector<16x32xf32>
    %97 = arith.addf %95, %96 : vector<16x32xf32>
    %cst_46 = arith.constant 0.000000e+00 : f32
    %98 = vector.broadcast %cst_46 : f32 to vector<16x32xf32>
    %99 = arith.maximumf %97, %98 : vector<16x32xf32>
    %100 = arith.truncf %99 : vector<16x32xf32> to vector<16x32xbf16>
    %cst_47 = arith.constant dense<0.000000e+00> : vector<32x32xf32>
    %101 = tpu.matmul %1, %100, %cst_47 {dimension_numbers = #tpu.dot_dimension_numbers<[1], [0], [0], [1], [0, 0, 1, 1], [], []>} : vector<32x16xbf16>, vector<16x32xbf16>, vector<32x32xf32> -> vector<32x32xf32>
    %102 = vector.broadcast %3 : vector<32x1xf32> to vector<32x32xf32>
    %103 = arith.addf %101, %102 : vector<32x32xf32>
    %cst_48 = arith.constant 0.000000e+00 : f32
    %104 = vector.broadcast %cst_48 : f32 to vector<32x32xf32>
    %105 = arith.maximumf %103, %104 : vector<32x32xf32>
    %106 = arith.truncf %105 : vector<32x32xf32> to vector<32x32xbf16>
    %107 = arith.maximumf %92, %106 : vector<32x32xbf16>
    %c7 = arith.constant 7 : index
    %c0_49 = arith.constant 0 : index
    %c0_50 = arith.constant 0 : index
    %108 = vector.load %arg1[%c7, %c0_49, %c0_50] : memref<8x6x32xbf16, #tpu.memory_space<vmem>>, vector<1x6x32xbf16>
    %109 = vector.shape_cast %108 : vector<1x6x32xbf16> to vector<6x32xbf16>
    %cst_51 = arith.constant dense<0.000000e+00> : vector<16x32xf32>
    %110 = tpu.matmul %0, %109, %cst_51 {dimension_numbers = #tpu.dot_dimension_numbers<[1], [0], [0], [1], [0, 0, 1, 1], [], []>} : vector<16x6xbf16>, vector<6x32xbf16>, vector<16x32xf32> -> vector<16x32xf32>
    %111 = vector.broadcast %2 : vector<16x1xf32> to vector<16x32xf32>
    %112 = arith.addf %110, %111 : vector<16x32xf32>
    %cst_52 = arith.constant 0.000000e+00 : f32
    %113 = vector.broadcast %cst_52 : f32 to vector<16x32xf32>
    %114 = arith.maximumf %112, %113 : vector<16x32xf32>
    %115 = arith.truncf %114 : vector<16x32xf32> to vector<16x32xbf16>
    %cst_53 = arith.constant dense<0.000000e+00> : vector<32x32xf32>
    %116 = tpu.matmul %1, %115, %cst_53 {dimension_numbers = #tpu.dot_dimension_numbers<[1], [0], [0], [1], [0, 0, 1, 1], [], []>} : vector<32x16xbf16>, vector<16x32xbf16>, vector<32x32xf32> -> vector<32x32xf32>
    %117 = vector.broadcast %3 : vector<32x1xf32> to vector<32x32xf32>
    %118 = arith.addf %116, %117 : vector<32x32xf32>
    %cst_54 = arith.constant 0.000000e+00 : f32
    %119 = vector.broadcast %cst_54 : f32 to vector<32x32xf32>
    %120 = arith.maximumf %118, %119 : vector<32x32xf32>
    %121 = arith.truncf %120 : vector<32x32xf32> to vector<32x32xbf16>
    %122 = arith.maximumf %107, %121 : vector<32x32xbf16>
    %c0_55 = arith.constant 0 : index
    %c0_56 = arith.constant 0 : index
    %123 = vector.load %arg6[%c0_55, %c0_56] : memref<32x32xbf16, #tpu.memory_space<vmem>>, vector<32x32xbf16>
    tpu.vector_store %arg6[%c0_55, %c0_56], %122 {strides = array<i32>} : memref<32x32xbf16, #tpu.memory_space<vmem>>, vector<32x32xbf16>,
    return
  }
  func.func @transform_0(%arg0: i32) -> (i32, i32, i32) {
    %c0_i32 = arith.constant 0 : i32
    %c0_i32_0 = arith.constant 0 : i32
    %c0_i32_1 = arith.constant 0 : i32
    return %c0_i32, %c0_i32_0, %arg0 : i32, i32, i32
  }
  func.func @transform_1(%arg0: i32) -> (i32, i32) {
    %c0_i32 = arith.constant 0 : i32
    %c0_i32_0 = arith.constant 0 : i32
    %c0_i32_1 = arith.constant 0 : i32
    return %c0_i32, %c0_i32_0 : i32, i32
  }
  func.func @transform_2(%arg0: i32) -> (i32, i32) {
    %c0_i32 = arith.constant 0 : i32
    %c0_i32_0 = arith.constant 0 : i32
    %c0_i32_1 = arith.constant 0 : i32
    return %c0_i32, %c0_i32_0 : i32, i32
  }
  func.func @transform_3(%arg0: i32) -> (i32, i32) {
    %c0_i32 = arith.constant 0 : i32
    %c0_i32_0 = arith.constant 0 : i32
    %c0_i32_1 = arith.constant 0 : i32
    return %c0_i32, %c0_i32_0 : i32, i32
  }
  func.func @transform_4(%arg0: i32) -> (i32, i32) {
    %c0_i32 = arith.constant 0 : i32
    %c0_i32_0 = arith.constant 0 : i32
    %c0_i32_1 = arith.constant 0 : i32
    return %c0_i32, %c0_i32_0 : i32, i32
  }
  func.func @transform_5(%arg0: i32) -> (i32, i32) {
    %c0_i32 = arith.constant 0 : i32
    %c0_i32_0 = arith.constant 0 : i32
    return %c0_i32, %arg0 : i32, i32
  }
}

module attributes {stable_mosaic.version = 11 : i64} {
  func.func @_mlp_max_kernel(%arg0: i32, %arg1: memref<16x6x32xbf16, #tpu.memory_space<vmem>>, %arg2: memref<32x6xbf16, #tpu.memory_space<vmem>>, %arg3: memref<32x1xf32, #tpu.memory_space<vmem>>, %arg4: memref<64x32xbf16, #tpu.memory_space<vmem>>, %arg5: memref<64x1xf32, #tpu.memory_space<vmem>>, %arg6: memref<64x32xbf16, #tpu.memory_space<vmem>>) attributes {dimension_semantics = [#tpu.dimension_semantics<parallel>], iteration_bounds = array<i64: 1>, scalar_prefetch = 0 : i64, scratch_operands = 0 : i64, tpu.core_type = #tpu.core_type<tc>, window_params = [{transform_indices = @transform_0, window_bounds = array<i64: 16, 6, 32>}, {pipeline_mode = #tpu.pipeline_mode<synchronous>, transform_indices = @transform_1, window_bounds = array<i64: 32, 6>}, {pipeline_mode = #tpu.pipeline_mode<synchronous>, transform_indices = @transform_2, window_bounds = array<i64: 32, 1>}, {pipeline_mode = #tpu.pipeline_mode<synchronous>, transform_indices = @transform_3, window_bounds = array<i64: 64, 32>}, {pipeline_mode = #tpu.pipeline_mode<synchronous>, transform_indices = @transform_4, window_bounds = array<i64: 64, 1>}, {transform_indices = @transform_5, window_bounds = array<i64: 64, 32>}]} {
    %c0 = arith.constant 0 : index
    %c0_0 = arith.constant 0 : index
    %0 = vector.load %arg2[%c0, %c0_0] : memref<32x6xbf16, #tpu.memory_space<vmem>>, vector<32x6xbf16>
    %c0_1 = arith.constant 0 : index
    %c0_2 = arith.constant 0 : index
    %1 = vector.load %arg4[%c0_1, %c0_2] : memref<64x32xbf16, #tpu.memory_space<vmem>>, vector<64x32xbf16>
    %c0_3 = arith.constant 0 : index
    %c0_4 = arith.constant 0 : index
    %2 = vector.load %arg3[%c0_3, %c0_4] : memref<32x1xf32, #tpu.memory_space<vmem>>, vector<32x1xf32>
    %c0_5 = arith.constant 0 : index
    %c0_6 = arith.constant 0 : index
    %3 = vector.load %arg5[%c0_5, %c0_6] : memref<64x1xf32, #tpu.memory_space<vmem>>, vector<64x1xf32>
    %c0_7 = arith.constant 0 : index
    %c0_8 = arith.constant 0 : index
    %c0_9 = arith.constant 0 : index
    %4 = vector.load %arg1[%c0_7, %c0_8, %c0_9] : memref<16x6x32xbf16, #tpu.memory_space<vmem>>, vector<1x6x32xbf16>
    %5 = vector.shape_cast %4 : vector<1x6x32xbf16> to vector<6x32xbf16>
    %cst = arith.constant dense<0.000000e+00> : vector<32x32xf32>
    %6 = tpu.matmul %0, %5, %cst {dimension_numbers = #tpu.dot_dimension_numbers<[1], [0], [0], [1], [0, 0, 1, 1], [], []>} : vector<32x6xbf16>, vector<6x32xbf16>, vector<32x32xf32> -> vector<32x32xf32>
    %7 = vector.broadcast %2 : vector<32x1xf32> to vector<32x32xf32>
    %8 = arith.addf %6, %7 : vector<32x32xf32>
    %cst_10 = arith.constant 0.000000e+00 : f32
    %9 = vector.broadcast %cst_10 : f32 to vector<32x32xf32>
    %10 = arith.maximumf %8, %9 : vector<32x32xf32>
    %11 = arith.truncf %10 : vector<32x32xf32> to vector<32x32xbf16>
    %cst_11 = arith.constant dense<0.000000e+00> : vector<64x32xf32>
    %12 = tpu.matmul %1, %11, %cst_11 {dimension_numbers = #tpu.dot_dimension_numbers<[1], [0], [0], [1], [0, 0, 1, 1], [], []>} : vector<64x32xbf16>, vector<32x32xbf16>, vector<64x32xf32> -> vector<64x32xf32>
    %13 = vector.broadcast %3 : vector<64x1xf32> to vector<64x32xf32>
    %14 = arith.addf %12, %13 : vector<64x32xf32>
    %cst_12 = arith.constant 0.000000e+00 : f32
    %15 = vector.broadcast %cst_12 : f32 to vector<64x32xf32>
    %16 = arith.maximumf %14, %15 : vector<64x32xf32>
    %17 = arith.truncf %16 : vector<64x32xf32> to vector<64x32xbf16>
    %c1 = arith.constant 1 : index
    %c0_13 = arith.constant 0 : index
    %c0_14 = arith.constant 0 : index
    %18 = vector.load %arg1[%c1, %c0_13, %c0_14] : memref<16x6x32xbf16, #tpu.memory_space<vmem>>, vector<1x6x32xbf16>
    %19 = vector.shape_cast %18 : vector<1x6x32xbf16> to vector<6x32xbf16>
    %cst_15 = arith.constant dense<0.000000e+00> : vector<32x32xf32>
    %20 = tpu.matmul %0, %19, %cst_15 {dimension_numbers = #tpu.dot_dimension_numbers<[1], [0], [0], [1], [0, 0, 1, 1], [], []>} : vector<32x6xbf16>, vector<6x32xbf16>, vector<32x32xf32> -> vector<32x32xf32>
    %21 = vector.broadcast %2 : vector<32x1xf32> to vector<32x32xf32>
    %22 = arith.addf %20, %21 : vector<32x32xf32>
    %cst_16 = arith.constant 0.000000e+00 : f32
    %23 = vector.broadcast %cst_16 : f32 to vector<32x32xf32>
    %24 = arith.maximumf %22, %23 : vector<32x32xf32>
    %25 = arith.truncf %24 : vector<32x32xf32> to vector<32x32xbf16>
    %cst_17 = arith.constant dense<0.000000e+00> : vector<64x32xf32>
    %26 = tpu.matmul %1, %25, %cst_17 {dimension_numbers = #tpu.dot_dimension_numbers<[1], [0], [0], [1], [0, 0, 1, 1], [], []>} : vector<64x32xbf16>, vector<32x32xbf16>, vector<64x32xf32> -> vector<64x32xf32>
    %27 = vector.broadcast %3 : vector<64x1xf32> to vector<64x32xf32>
    %28 = arith.addf %26, %27 : vector<64x32xf32>
    %cst_18 = arith.constant 0.000000e+00 : f32
    %29 = vector.broadcast %cst_18 : f32 to vector<64x32xf32>
    %30 = arith.maximumf %28, %29 : vector<64x32xf32>
    %31 = arith.truncf %30 : vector<64x32xf32> to vector<64x32xbf16>
    %32 = arith.maximumf %17, %31 : vector<64x32xbf16>
    %c2 = arith.constant 2 : index
    %c0_19 = arith.constant 0 : index
    %c0_20 = arith.constant 0 : index
    %33 = vector.load %arg1[%c2, %c0_19, %c0_20] : memref<16x6x32xbf16, #tpu.memory_space<vmem>>, vector<1x6x32xbf16>
    %34 = vector.shape_cast %33 : vector<1x6x32xbf16> to vector<6x32xbf16>
    %cst_21 = arith.constant dense<0.000000e+00> : vector<32x32xf32>
    %35 = tpu.matmul %0, %34, %cst_21 {dimension_numbers = #tpu.dot_dimension_numbers<[1], [0], [0], [1], [0, 0, 1, 1], [], []>} : vector<32x6xbf16>, vector<6x32xbf16>, vector<32x32xf32> -> vector<32x32xf32>
    %36 = vector.broadcast %2 : vector<32x1xf32> to vector<32x32xf32>
    %37 = arith.addf %35, %36 : vector<32x32xf32>
    %cst_22 = arith.constant 0.000000e+00 : f32
    %38 = vector.broadcast %cst_22 : f32 to vector<32x32xf32>
    %39 = arith.maximumf %37, %38 : vector<32x32xf32>
    %40 = arith.truncf %39 : vector<32x32xf32> to vector<32x32xbf16>
    %cst_23 = arith.constant dense<0.000000e+00> : vector<64x32xf32>
    %41 = tpu.matmul %1, %40, %cst_23 {dimension_numbers = #tpu.dot_dimension_numbers<[1], [0], [0], [1], [0, 0, 1, 1], [], []>} : vector<64x32xbf16>, vector<32x32xbf16>, vector<64x32xf32> -> vector<64x32xf32>
    %42 = vector.broadcast %3 : vector<64x1xf32> to vector<64x32xf32>
    %43 = arith.addf %41, %42 : vector<64x32xf32>
    %cst_24 = arith.constant 0.000000e+00 : f32
    %44 = vector.broadcast %cst_24 : f32 to vector<64x32xf32>
    %45 = arith.maximumf %43, %44 : vector<64x32xf32>
    %46 = arith.truncf %45 : vector<64x32xf32> to vector<64x32xbf16>
    %47 = arith.maximumf %32, %46 : vector<64x32xbf16>
    %c3 = arith.constant 3 : index
    %c0_25 = arith.constant 0 : index
    %c0_26 = arith.constant 0 : index
    %48 = vector.load %arg1[%c3, %c0_25, %c0_26] : memref<16x6x32xbf16, #tpu.memory_space<vmem>>, vector<1x6x32xbf16>
    %49 = vector.shape_cast %48 : vector<1x6x32xbf16> to vector<6x32xbf16>
    %cst_27 = arith.constant dense<0.000000e+00> : vector<32x32xf32>
    %50 = tpu.matmul %0, %49, %cst_27 {dimension_numbers = #tpu.dot_dimension_numbers<[1], [0], [0], [1], [0, 0, 1, 1], [], []>} : vector<32x6xbf16>, vector<6x32xbf16>, vector<32x32xf32> -> vector<32x32xf32>
    %51 = vector.broadcast %2 : vector<32x1xf32> to vector<32x32xf32>
    %52 = arith.addf %50, %51 : vector<32x32xf32>
    %cst_28 = arith.constant 0.000000e+00 : f32
    %53 = vector.broadcast %cst_28 : f32 to vector<32x32xf32>
    %54 = arith.maximumf %52, %53 : vector<32x32xf32>
    %55 = arith.truncf %54 : vector<32x32xf32> to vector<32x32xbf16>
    %cst_29 = arith.constant dense<0.000000e+00> : vector<64x32xf32>
    %56 = tpu.matmul %1, %55, %cst_29 {dimension_numbers = #tpu.dot_dimension_numbers<[1], [0], [0], [1], [0, 0, 1, 1], [], []>} : vector<64x32xbf16>, vector<32x32xbf16>, vector<64x32xf32> -> vector<64x32xf32>
    %57 = vector.broadcast %3 : vector<64x1xf32> to vector<64x32xf32>
    %58 = arith.addf %56, %57 : vector<64x32xf32>
    %cst_30 = arith.constant 0.000000e+00 : f32
    %59 = vector.broadcast %cst_30 : f32 to vector<64x32xf32>
    %60 = arith.maximumf %58, %59 : vector<64x32xf32>
    %61 = arith.truncf %60 : vector<64x32xf32> to vector<64x32xbf16>
    %62 = arith.maximumf %47, %61 : vector<64x32xbf16>
    %c4 = arith.constant 4 : index
    %c0_31 = arith.constant 0 : index
    %c0_32 = arith.constant 0 : index
    %63 = vector.load %arg1[%c4, %c0_31, %c0_32] : memref<16x6x32xbf16, #tpu.memory_space<vmem>>, vector<1x6x32xbf16>
    %64 = vector.shape_cast %63 : vector<1x6x32xbf16> to vector<6x32xbf16>
    %cst_33 = arith.constant dense<0.000000e+00> : vector<32x32xf32>
    %65 = tpu.matmul %0, %64, %cst_33 {dimension_numbers = #tpu.dot_dimension_numbers<[1], [0], [0], [1], [0, 0, 1, 1], [], []>} : vector<32x6xbf16>, vector<6x32xbf16>, vector<32x32xf32> -> vector<32x32xf32>
    %66 = vector.broadcast %2 : vector<32x1xf32> to vector<32x32xf32>
    %67 = arith.addf %65, %66 : vector<32x32xf32>
    %cst_34 = arith.constant 0.000000e+00 : f32
    %68 = vector.broadcast %cst_34 : f32 to vector<32x32xf32>
    %69 = arith.maximumf %67, %68 : vector<32x32xf32>
    %70 = arith.truncf %69 : vector<32x32xf32> to vector<32x32xbf16>
    %cst_35 = arith.constant dense<0.000000e+00> : vector<64x32xf32>
    %71 = tpu.matmul %1, %70, %cst_35 {dimension_numbers = #tpu.dot_dimension_numbers<[1], [0], [0], [1], [0, 0, 1, 1], [], []>} : vector<64x32xbf16>, vector<32x32xbf16>, vector<64x32xf32> -> vector<64x32xf32>
    %72 = vector.broadcast %3 : vector<64x1xf32> to vector<64x32xf32>
    %73 = arith.addf %71, %72 : vector<64x32xf32>
    %cst_36 = arith.constant 0.000000e+00 : f32
    %74 = vector.broadcast %cst_36 : f32 to vector<64x32xf32>
    %75 = arith.maximumf %73, %74 : vector<64x32xf32>
    %76 = arith.truncf %75 : vector<64x32xf32> to vector<64x32xbf16>
    %77 = arith.maximumf %62, %76 : vector<64x32xbf16>
    %c5 = arith.constant 5 : index
    %c0_37 = arith.constant 0 : index
    %c0_38 = arith.constant 0 : index
    %78 = vector.load %arg1[%c5, %c0_37, %c0_38] : memref<16x6x32xbf16, #tpu.memory_space<vmem>>, vector<1x6x32xbf16>
    %79 = vector.shape_cast %78 : vector<1x6x32xbf16> to vector<6x32xbf16>
    %cst_39 = arith.constant dense<0.000000e+00> : vector<32x32xf32>
    %80 = tpu.matmul %0, %79, %cst_39 {dimension_numbers = #tpu.dot_dimension_numbers<[1], [0], [0], [1], [0, 0, 1, 1], [], []>} : vector<32x6xbf16>, vector<6x32xbf16>, vector<32x32xf32> -> vector<32x32xf32>
    %81 = vector.broadcast %2 : vector<32x1xf32> to vector<32x32xf32>
    %82 = arith.addf %80, %81 : vector<32x32xf32>
    %cst_40 = arith.constant 0.000000e+00 : f32
    %83 = vector.broadcast %cst_40 : f32 to vector<32x32xf32>
    %84 = arith.maximumf %82, %83 : vector<32x32xf32>
    %85 = arith.truncf %84 : vector<32x32xf32> to vector<32x32xbf16>
    %cst_41 = arith.constant dense<0.000000e+00> : vector<64x32xf32>
    %86 = tpu.matmul %1, %85, %cst_41 {dimension_numbers = #tpu.dot_dimension_numbers<[1], [0], [0], [1], [0, 0, 1, 1], [], []>} : vector<64x32xbf16>, vector<32x32xbf16>, vector<64x32xf32> -> vector<64x32xf32>
    %87 = vector.broadcast %3 : vector<64x1xf32> to vector<64x32xf32>
    %88 = arith.addf %86, %87 : vector<64x32xf32>
    %cst_42 = arith.constant 0.000000e+00 : f32
    %89 = vector.broadcast %cst_42 : f32 to vector<64x32xf32>
    %90 = arith.maximumf %88, %89 : vector<64x32xf32>
    %91 = arith.truncf %90 : vector<64x32xf32> to vector<64x32xbf16>
    %92 = arith.maximumf %77, %91 : vector<64x32xbf16>
    %c6 = arith.constant 6 : index
    %c0_43 = arith.constant 0 : index
    %c0_44 = arith.constant 0 : index
    %93 = vector.load %arg1[%c6, %c0_43, %c0_44] : memref<16x6x32xbf16, #tpu.memory_space<vmem>>, vector<1x6x32xbf16>
    %94 = vector.shape_cast %93 : vector<1x6x32xbf16> to vector<6x32xbf16>
    %cst_45 = arith.constant dense<0.000000e+00> : vector<32x32xf32>
    %95 = tpu.matmul %0, %94, %cst_45 {dimension_numbers = #tpu.dot_dimension_numbers<[1], [0], [0], [1], [0, 0, 1, 1], [], []>} : vector<32x6xbf16>, vector<6x32xbf16>, vector<32x32xf32> -> vector<32x32xf32>
    %96 = vector.broadcast %2 : vector<32x1xf32> to vector<32x32xf32>
    %97 = arith.addf %95, %96 : vector<32x32xf32>
    %cst_46 = arith.constant 0.000000e+00 : f32
    %98 = vector.broadcast %cst_46 : f32 to vector<32x32xf32>
    %99 = arith.maximumf %97, %98 : vector<32x32xf32>
    %100 = arith.truncf %99 : vector<32x32xf32> to vector<32x32xbf16>
    %cst_47 = arith.constant dense<0.000000e+00> : vector<64x32xf32>
    %101 = tpu.matmul %1, %100, %cst_47 {dimension_numbers = #tpu.dot_dimension_numbers<[1], [0], [0], [1], [0, 0, 1, 1], [], []>} : vector<64x32xbf16>, vector<32x32xbf16>, vector<64x32xf32> -> vector<64x32xf32>
    %102 = vector.broadcast %3 : vector<64x1xf32> to vector<64x32xf32>
    %103 = arith.addf %101, %102 : vector<64x32xf32>
    %cst_48 = arith.constant 0.000000e+00 : f32
    %104 = vector.broadcast %cst_48 : f32 to vector<64x32xf32>
    %105 = arith.maximumf %103, %104 : vector<64x32xf32>
    %106 = arith.truncf %105 : vector<64x32xf32> to vector<64x32xbf16>
    %107 = arith.maximumf %92, %106 : vector<64x32xbf16>
    %c7 = arith.constant 7 : index
    %c0_49 = arith.constant 0 : index
    %c0_50 = arith.constant 0 : index
    %108 = vector.load %arg1[%c7, %c0_49, %c0_50] : memref<16x6x32xbf16, #tpu.memory_space<vmem>>, vector<1x6x32xbf16>
    %109 = vector.shape_cast %108 : vector<1x6x32xbf16> to vector<6x32xbf16>
    %cst_51 = arith.constant dense<0.000000e+00> : vector<32x32xf32>
    %110 = tpu.matmul %0, %109, %cst_51 {dimension_numbers = #tpu.dot_dimension_numbers<[1], [0], [0], [1], [0, 0, 1, 1], [], []>} : vector<32x6xbf16>, vector<6x32xbf16>, vector<32x32xf32> -> vector<32x32xf32>
    %111 = vector.broadcast %2 : vector<32x1xf32> to vector<32x32xf32>
    %112 = arith.addf %110, %111 : vector<32x32xf32>
    %cst_52 = arith.constant 0.000000e+00 : f32
    %113 = vector.broadcast %cst_52 : f32 to vector<32x32xf32>
    %114 = arith.maximumf %112, %113 : vector<32x32xf32>
    %115 = arith.truncf %114 : vector<32x32xf32> to vector<32x32xbf16>
    %cst_53 = arith.constant dense<0.000000e+00> : vector<64x32xf32>
    %116 = tpu.matmul %1, %115, %cst_53 {dimension_numbers = #tpu.dot_dimension_numbers<[1], [0], [0], [1], [0, 0, 1, 1], [], []>} : vector<64x32xbf16>, vector<32x32xbf16>, vector<64x32xf32> -> vector<64x32xf32>
    %117 = vector.broadcast %3 : vector<64x1xf32> to vector<64x32xf32>
    %118 = arith.addf %116, %117 : vector<64x32xf32>
    %cst_54 = arith.constant 0.000000e+00 : f32
    %119 = vector.broadcast %cst_54 : f32 to vector<64x32xf32>
    %120 = arith.maximumf %118, %119 : vector<64x32xf32>
    %121 = arith.truncf %120 : vector<64x32xf32> to vector<64x32xbf16>
    %122 = arith.maximumf %107, %121 : vector<64x32xbf16>
    %c8 = arith.constant 8 : index
    %c0_55 = arith.constant 0 : index
    %c0_56 = arith.constant 0 : index
    %123 = vector.load %arg1[%c8, %c0_55, %c0_56] : memref<16x6x32xbf16, #tpu.memory_space<vmem>>, vector<1x6x32xbf16>
    %124 = vector.shape_cast %123 : vector<1x6x32xbf16> to vector<6x32xbf16>
    %cst_57 = arith.constant dense<0.000000e+00> : vector<32x32xf32>
    %125 = tpu.matmul %0, %124, %cst_57 {dimension_numbers = #tpu.dot_dimension_numbers<[1], [0], [0], [1], [0, 0, 1, 1], [], []>} : vector<32x6xbf16>, vector<6x32xbf16>, vector<32x32xf32> -> vector<32x32xf32>
    %126 = vector.broadcast %2 : vector<32x1xf32> to vector<32x32xf32>
    %127 = arith.addf %125, %126 : vector<32x32xf32>
    %cst_58 = arith.constant 0.000000e+00 : f32
    %128 = vector.broadcast %cst_58 : f32 to vector<32x32xf32>
    %129 = arith.maximumf %127, %128 : vector<32x32xf32>
    %130 = arith.truncf %129 : vector<32x32xf32> to vector<32x32xbf16>
    %cst_59 = arith.constant dense<0.000000e+00> : vector<64x32xf32>
    %131 = tpu.matmul %1, %130, %cst_59 {dimension_numbers = #tpu.dot_dimension_numbers<[1], [0], [0], [1], [0, 0, 1, 1], [], []>} : vector<64x32xbf16>, vector<32x32xbf16>, vector<64x32xf32> -> vector<64x32xf32>
    %132 = vector.broadcast %3 : vector<64x1xf32> to vector<64x32xf32>
    %133 = arith.addf %131, %132 : vector<64x32xf32>
    %cst_60 = arith.constant 0.000000e+00 : f32
    %134 = vector.broadcast %cst_60 : f32 to vector<64x32xf32>
    %135 = arith.maximumf %133, %134 : vector<64x32xf32>
    %136 = arith.truncf %135 : vector<64x32xf32> to vector<64x32xbf16>
    %137 = arith.maximumf %122, %136 : vector<64x32xbf16>
    %c9 = arith.constant 9 : index
    %c0_61 = arith.constant 0 : index
    %c0_62 = arith.constant 0 : index
    %138 = vector.load %arg1[%c9, %c0_61, %c0_62] : memref<16x6x32xbf16, #tpu.memory_space<vmem>>, vector<1x6x32xbf16>
    %139 = vector.shape_cast %138 : vector<1x6x32xbf16> to vector<6x32xbf16>
    %cst_63 = arith.constant dense<0.000000e+00> : vector<32x32xf32>
    %140 = tpu.matmul %0, %139, %cst_63 {dimension_numbers = #tpu.dot_dimension_numbers<[1], [0], [0], [1], [0, 0, 1, 1], [], []>} : vector<32x6xbf16>, vector<6x32xbf16>, vector<32x32xf32> -> vector<32x32xf32>
    %141 = vector.broadcast %2 : vector<32x1xf32> to vector<32x32xf32>
    %142 = arith.addf %140, %141 : vector<32x32xf32>
    %cst_64 = arith.constant 0.000000e+00 : f32
    %143 = vector.broadcast %cst_64 : f32 to vector<32x32xf32>
    %144 = arith.maximumf %142, %143 : vector<32x32xf32>
    %145 = arith.truncf %144 : vector<32x32xf32> to vector<32x32xbf16>
    %cst_65 = arith.constant dense<0.000000e+00> : vector<64x32xf32>
    %146 = tpu.matmul %1, %145, %cst_65 {dimension_numbers = #tpu.dot_dimension_numbers<[1], [0], [0], [1], [0, 0, 1, 1], [], []>} : vector<64x32xbf16>, vector<32x32xbf16>, vector<64x32xf32> -> vector<64x32xf32>
    %147 = vector.broadcast %3 : vector<64x1xf32> to vector<64x32xf32>
    %148 = arith.addf %146, %147 : vector<64x32xf32>
    %cst_66 = arith.constant 0.000000e+00 : f32
    %149 = vector.broadcast %cst_66 : f32 to vector<64x32xf32>
    %150 = arith.maximumf %148, %149 : vector<64x32xf32>
    %151 = arith.truncf %150 : vector<64x32xf32> to vector<64x32xbf16>
    %152 = arith.maximumf %137, %151 : vector<64x32xbf16>
    %c10 = arith.constant 10 : index
    %c0_67 = arith.constant 0 : index
    %c0_68 = arith.constant 0 : index
    %153 = vector.load %arg1[%c10, %c0_67, %c0_68] : memref<16x6x32xbf16, #tpu.memory_space<vmem>>, vector<1x6x32xbf16>
    %154 = vector.shape_cast %153 : vector<1x6x32xbf16> to vector<6x32xbf16>
    %cst_69 = arith.constant dense<0.000000e+00> : vector<32x32xf32>
    %155 = tpu.matmul %0, %154, %cst_69 {dimension_numbers = #tpu.dot_dimension_numbers<[1], [0], [0], [1], [0, 0, 1, 1], [], []>} : vector<32x6xbf16>, vector<6x32xbf16>, vector<32x32xf32> -> vector<32x32xf32>
    %156 = vector.broadcast %2 : vector<32x1xf32> to vector<32x32xf32>
    %157 = arith.addf %155, %156 : vector<32x32xf32>
    %cst_70 = arith.constant 0.000000e+00 : f32
    %158 = vector.broadcast %cst_70 : f32 to vector<32x32xf32>
    %159 = arith.maximumf %157, %158 : vector<32x32xf32>
    %160 = arith.truncf %159 : vector<32x32xf32> to vector<32x32xbf16>
    %cst_71 = arith.constant dense<0.000000e+00> : vector<64x32xf32>
    %161 = tpu.matmul %1, %160, %cst_71 {dimension_numbers = #tpu.dot_dimension_numbers<[1], [0], [0], [1], [0, 0, 1, 1], [], []>} : vector<64x32xbf16>, vector<32x32xbf16>, vector<64x32xf32> -> vector<64x32xf32>
    %162 = vector.broadcast %3 : vector<64x1xf32> to vector<64x32xf32>
    %163 = arith.addf %161, %162 : vector<64x32xf32>
    %cst_72 = arith.constant 0.000000e+00 : f32
    %164 = vector.broadcast %cst_72 : f32 to vector<64x32xf32>
    %165 = arith.maximumf %163, %164 : vector<64x32xf32>
    %166 = arith.truncf %165 : vector<64x32xf32> to vector<64x32xbf16>
    %167 = arith.maximumf %152, %166 : vector<64x32xbf16>
    %c11 = arith.constant 11 : index
    %c0_73 = arith.constant 0 : index
    %c0_74 = arith.constant 0 : index
    %168 = vector.load %arg1[%c11, %c0_73, %c0_74] : memref<16x6x32xbf16, #tpu.memory_space<vmem>>, vector<1x6x32xbf16>
    %169 = vector.shape_cast %168 : vector<1x6x32xbf16> to vector<6x32xbf16>
    %cst_75 = arith.constant dense<0.000000e+00> : vector<32x32xf32>
    %170 = tpu.matmul %0, %169, %cst_75 {dimension_numbers = #tpu.dot_dimension_numbers<[1], [0], [0], [1], [0, 0, 1, 1], [], []>} : vector<32x6xbf16>, vector<6x32xbf16>, vector<32x32xf32> -> vector<32x32xf32>
    %171 = vector.broadcast %2 : vector<32x1xf32> to vector<32x32xf32>
    %172 = arith.addf %170, %171 : vector<32x32xf32>
    %cst_76 = arith.constant 0.000000e+00 : f32
    %173 = vector.broadcast %cst_76 : f32 to vector<32x32xf32>
    %174 = arith.maximumf %172, %173 : vector<32x32xf32>
    %175 = arith.truncf %174 : vector<32x32xf32> to vector<32x32xbf16>
    %cst_77 = arith.constant dense<0.000000e+00> : vector<64x32xf32>
    %176 = tpu.matmul %1, %175, %cst_77 {dimension_numbers = #tpu.dot_dimension_numbers<[1], [0], [0], [1], [0, 0, 1, 1], [], []>} : vector<64x32xbf16>, vector<32x32xbf16>, vector<64x32xf32> -> vector<64x32xf32>
    %177 = vector.broadcast %3 : vector<64x1xf32> to vector<64x32xf32>
    %178 = arith.addf %176, %177 : vector<64x32xf32>
    %cst_78 = arith.constant 0.000000e+00 : f32
    %179 = vector.broadcast %cst_78 : f32 to vector<64x32xf32>
    %180 = arith.maximumf %178, %179 : vector<64x32xf32>
    %181 = arith.truncf %180 : vector<64x32xf32> to vector<64x32xbf16>
    %182 = arith.maximumf %167, %181 : vector<64x32xbf16>
    %c12 = arith.constant 12 : index
    %c0_79 = arith.constant 0 : index
    %c0_80 = arith.constant 0 : index
    %183 = vector.load %arg1[%c12, %c0_79, %c0_80] : memref<16x6x32xbf16, #tpu.memory_space<vmem>>, vector<1x6x32xbf16>
    %184 = vector.shape_cast %183 : vector<1x6x32xbf16> to vector<6x32xbf16>
    %cst_81 = arith.constant dense<0.000000e+00> : vector<32x32xf32>
    %185 = tpu.matmul %0, %184, %cst_81 {dimension_numbers = #tpu.dot_dimension_numbers<[1], [0], [0], [1], [0, 0, 1, 1], [], []>} : vector<32x6xbf16>, vector<6x32xbf16>, vector<32x32xf32> -> vector<32x32xf32>
    %186 = vector.broadcast %2 : vector<32x1xf32> to vector<32x32xf32>
    %187 = arith.addf %185, %186 : vector<32x32xf32>
    %cst_82 = arith.constant 0.000000e+00 : f32
    %188 = vector.broadcast %cst_82 : f32 to vector<32x32xf32>
    %189 = arith.maximumf %187, %188 : vector<32x32xf32>
    %190 = arith.truncf %189 : vector<32x32xf32> to vector<32x32xbf16>
    %cst_83 = arith.constant dense<0.000000e+00> : vector<64x32xf32>
    %191 = tpu.matmul %1, %190, %cst_83 {dimension_numbers = #tpu.dot_dimension_numbers<[1], [0], [0], [1], [0, 0, 1, 1], [], []>} : vector<64x32xbf16>, vector<32x32xbf16>, vector<64x32xf32> -> vector<64x32xf32>
    %192 = vector.broadcast %3 : vector<64x1xf32> to vector<64x32xf32>
    %193 = arith.addf %191, %192 : vector<64x32xf32>
    %cst_84 = arith.constant 0.000000e+00 : f32
    %194 = vector.broadcast %cst_84 : f32 to vector<64x32xf32>
    %195 = arith.maximumf %193, %194 : vector<64x32xf32>
    %196 = arith.truncf %195 : vector<64x32xf32> to vector<64x32xbf16>
    %197 = arith.maximumf %182, %196 : vector<64x32xbf16>
    %c13 = arith.constant 13 : index
    %c0_85 = arith.constant 0 : index
    %c0_86 = arith.constant 0 : index
    %198 = vector.load %arg1[%c13, %c0_85, %c0_86] : memref<16x6x32xbf16, #tpu.memory_space<vmem>>, vector<1x6x32xbf16>
    %199 = vector.shape_cast %198 : vector<1x6x32xbf16> to vector<6x32xbf16>
    %cst_87 = arith.constant dense<0.000000e+00> : vector<32x32xf32>
    %200 = tpu.matmul %0, %199, %cst_87 {dimension_numbers = #tpu.dot_dimension_numbers<[1], [0], [0], [1], [0, 0, 1, 1], [], []>} : vector<32x6xbf16>, vector<6x32xbf16>, vector<32x32xf32> -> vector<32x32xf32>
    %201 = vector.broadcast %2 : vector<32x1xf32> to vector<32x32xf32>
    %202 = arith.addf %200, %201 : vector<32x32xf32>
    %cst_88 = arith.constant 0.000000e+00 : f32
    %203 = vector.broadcast %cst_88 : f32 to vector<32x32xf32>
    %204 = arith.maximumf %202, %203 : vector<32x32xf32>
    %205 = arith.truncf %204 : vector<32x32xf32> to vector<32x32xbf16>
    %cst_89 = arith.constant dense<0.000000e+00> : vector<64x32xf32>
    %206 = tpu.matmul %1, %205, %cst_89 {dimension_numbers = #tpu.dot_dimension_numbers<[1], [0], [0], [1], [0, 0, 1, 1], [], []>} : vector<64x32xbf16>, vector<32x32xbf16>, vector<64x32xf32> -> vector<64x32xf32>
    %207 = vector.broadcast %3 : vector<64x1xf32> to vector<64x32xf32>
    %208 = arith.addf %206, %207 : vector<64x32xf32>
    %cst_90 = arith.constant 0.000000e+00 : f32
    %209 = vector.broadcast %cst_90 : f32 to vector<64x32xf32>
    %210 = arith.maximumf %208, %209 : vector<64x32xf32>
    %211 = arith.truncf %210 : vector<64x32xf32> to vector<64x32xbf16>
    %212 = arith.maximumf %197, %211 : vector<64x32xbf16>
    %c14 = arith.constant 14 : index
    %c0_91 = arith.constant 0 : index
    %c0_92 = arith.constant 0 : index
    %213 = vector.load %arg1[%c14, %c0_91, %c0_92] : memref<16x6x32xbf16, #tpu.memory_space<vmem>>, vector<1x6x32xbf16>
    %214 = vector.shape_cast %213 : vector<1x6x32xbf16> to vector<6x32xbf16>
    %cst_93 = arith.constant dense<0.000000e+00> : vector<32x32xf32>
    %215 = tpu.matmul %0, %214, %cst_93 {dimension_numbers = #tpu.dot_dimension_numbers<[1], [0], [0], [1], [0, 0, 1, 1], [], []>} : vector<32x6xbf16>, vector<6x32xbf16>, vector<32x32xf32> -> vector<32x32xf32>
    %216 = vector.broadcast %2 : vector<32x1xf32> to vector<32x32xf32>
    %217 = arith.addf %215, %216 : vector<32x32xf32>
    %cst_94 = arith.constant 0.000000e+00 : f32
    %218 = vector.broadcast %cst_94 : f32 to vector<32x32xf32>
    %219 = arith.maximumf %217, %218 : vector<32x32xf32>
    %220 = arith.truncf %219 : vector<32x32xf32> to vector<32x32xbf16>
    %cst_95 = arith.constant dense<0.000000e+00> : vector<64x32xf32>
    %221 = tpu.matmul %1, %220, %cst_95 {dimension_numbers = #tpu.dot_dimension_numbers<[1], [0], [0], [1], [0, 0, 1, 1], [], []>} : vector<64x32xbf16>, vector<32x32xbf16>, vector<64x32xf32> -> vector<64x32xf32>
    %222 = vector.broadcast %3 : vector<64x1xf32> to vector<64x32xf32>
    %223 = arith.addf %221, %222 : vector<64x32xf32>
    %cst_96 = arith.constant 0.000000e+00 : f32
    %224 = vector.broadcast %cst_96 : f32 to vector<64x32xf32>
    %225 = arith.maximumf %223, %224 : vector<64x32xf32>
    %226 = arith.truncf %225 : vector<64x32xf32> to vector<64x32xbf16>
    %227 = arith.maximumf %212, %226 : vector<64x32xbf16>
    %c15 = arith.constant 15 : index
    %c0_97 = arith.constant 0 : index
    %c0_98 = arith.constant 0 : index
    %228 = vector.load %arg1[%c15, %c0_97, %c0_98] : memref<16x6x32xbf16, #tpu.memory_space<vmem>>, vector<1x6x32xbf16>
    %229 = vector.shape_cast %228 : vector<1x6x32xbf16> to vector<6x32xbf16>
    %cst_99 = arith.constant dense<0.000000e+00> : vector<32x32xf32>
    %230 = tpu.matmul %0, %229, %cst_99 {dimension_numbers = #tpu.dot_dimension_numbers<[1], [0], [0], [1], [0, 0, 1, 1], [], []>} : vector<32x6xbf16>, vector<6x32xbf16>, vector<32x32xf32> -> vector<32x32xf32>
    %231 = vector.broadcast %2 : vector<32x1xf32> to vector<32x32xf32>
    %232 = arith.addf %230, %231 : vector<32x32xf32>
    %cst_100 = arith.constant 0.000000e+00 : f32
    %233 = vector.broadcast %cst_100 : f32 to vector<32x32xf32>
    %234 = arith.maximumf %232, %233 : vector<32x32xf32>
    %235 = arith.truncf %234 : vector<32x32xf32> to vector<32x32xbf16>
    %cst_101 = arith.constant dense<0.000000e+00> : vector<64x32xf32>
    %236 = tpu.matmul %1, %235, %cst_101 {dimension_numbers = #tpu.dot_dimension_numbers<[1], [0], [0], [1], [0, 0, 1, 1], [], []>} : vector<64x32xbf16>, vector<32x32xbf16>, vector<64x32xf32> -> vector<64x32xf32>
    %237 = vector.broadcast %3 : vector<64x1xf32> to vector<64x32xf32>
    %238 = arith.addf %236, %237 : vector<64x32xf32>
    %cst_102 = arith.constant 0.000000e+00 : f32
    %239 = vector.broadcast %cst_102 : f32 to vector<64x32xf32>
    %240 = arith.maximumf %238, %239 : vector<64x32xf32>
    %241 = arith.truncf %240 : vector<64x32xf32> to vector<64x32xbf16>
    %242 = arith.maximumf %227, %241 : vector<64x32xbf16>
    %c0_103 = arith.constant 0 : index
    %c0_104 = arith.constant 0 : index
    %243 = vector.load %arg6[%c0_103, %c0_104] : memref<64x32xbf16, #tpu.memory_space<vmem>>, vector<64x32xbf16>
    tpu.vector_store %arg6[%c0_103, %c0_104], %242 {strides = array<i32>} : memref<64x32xbf16, #tpu.memory_space<vmem>>, vector<64x32xbf16>,
    return
  }
  func.func @transform_0(%arg0: i32) -> (i32, i32, i32) {
    %c0_i32 = arith.constant 0 : i32
    %c0_i32_0 = arith.constant 0 : i32
    %c0_i32_1 = arith.constant 0 : i32
    return %c0_i32, %c0_i32_0, %arg0 : i32, i32, i32
  }
  func.func @transform_1(%arg0: i32) -> (i32, i32) {
    %c0_i32 = arith.constant 0 : i32
    %c0_i32_0 = arith.constant 0 : i32
    %c0_i32_1 = arith.constant 0 : i32
    return %c0_i32, %c0_i32_0 : i32, i32
  }
  func.func @transform_2(%arg0: i32) -> (i32, i32) {
    %c0_i32 = arith.constant 0 : i32
    %c0_i32_0 = arith.constant 0 : i32
    %c0_i32_1 = arith.constant 0 : i32
    return %c0_i32, %c0_i32_0 : i32, i32
  }
  func.func @transform_3(%arg0: i32) -> (i32, i32) {
    %c0_i32 = arith.constant 0 : i32
    %c0_i32_0 = arith.constant 0 : i32
    %c0_i32_1 = arith.constant 0 : i32
    return %c0_i32, %c0_i32_0 : i32, i32
  }
  func.func @transform_4(%arg0: i32) -> (i32, i32) {
    %c0_i32 = arith.constant 0 : i32
    %c0_i32_0 = arith.constant 0 : i32
    %c0_i32_1 = arith.constant 0 : i32
    return %c0_i32, %c0_i32_0 : i32, i32
  }
  func.func @transform_5(%arg0: i32) -> (i32, i32) {
    %c0_i32 = arith.constant 0 : i32
    %c0_i32_0 = arith.constant 0 : i32
    return %c0_i32, %arg0 : i32, i32
  }
}

</mosaic_0001>

<bundles_post_ra>
// kernel: custom-call.14
= control target key start
LH: loop header
LB: loop body
LE: loop exit
PB: predicated region body
PF: predicated region fallthrough
CT: control target
= control target key end

     0   :  { %s6_s0 = inlined_call_operand.vmem [shape: s32[16,2], index: 0, kind: output, shape index: {}]  }

// kernel: custom-call.12
= control target key start
LH: loop header
LB: loop body
LE: loop exit
PB: predicated region body
PF: predicated region fallthrough
CT: control target
= control target key end

     0   :  { %s6_s0 = inlined_call_operand.vmem [shape: f32[2,64], index: 0, kind: output, shape index: {}]  }

// kernel: a_call__.2
= control target key start
LH: loop header
LB: loop body
LE: loop exit
PB: predicated region body
PF: predicated region fallthrough
CT: control target
= control target key end

     0   :  { %vm53_vm0 = vcmask 1042432   ;;  %v1140_v0 = vmov 0.0   ;;  %vm1141_vm1 = vmmov 0   ;;  %vm49_vm2 = vcmask 48128   ;;  %s1356_s0 = inlined_call_operand.vmem [shape: bf16[8,6,32], index: 0, kind: input, shape index: {}]   ;;  %s1357_s1 = inlined_call_operand.vmem [shape: bf16[16,6], index: 1, kind: input, shape index: {}]   ;;  %s1358_s2 = inlined_call_operand.vmem [shape: f32[16,1], index: 2, kind: input, shape index: {}]   ;;  %s1359_s4 = inlined_call_operand.vmem [shape: f32[32,1], index: 4, kind: input, shape index: {}]   ;;  %s1360_s3 = inlined_call_operand.vmem [shape: bf16[32,16], index: 3, kind: input, shape index: {}]   ;;  %s1361_s5 = inlined_call_operand.vmem [shape: bf16[32,32], index: 5, kind: output, shape index: {}]  }
   0x1   :  { %1036 = vmatprep.subr.bf16.mxu0 %v1140_v0  ;;  %v33_v1 = vld [vmem:[%s1356_s0] sm:$0x7]  ;;  %1038 = vmatprep.mubr.msk.bf16.mxu0 %vm1141_vm1, %v1140_v0  ;;  %v964_v4 = vld [vmem:[%s1356_s0 + $0x4] sm:$0x7]  ;;  %v1142_v7 = vmov 0   ;;  %v28_v9 = vld [vmem:[%s1358_s2 + $0x8] sm:$0xff] }
   0x2   :  { %v55_v2 = vsel %vm53_vm0, %v33_v1, 0  ;;  %v1137_v3 = vld [vmem:[%s1357_s1] sm:$0xff]   ;;  %v196_v5 = vsel %vm53_vm0, %v964_v4, 0  ;;  %1135 = vset.pattern.permute.xlu0 %v1142_v7  ;;  %v968_v8 = vld [vmem:[%s1356_s0 + $0x8] sm:$0x7]  ;;  %1136 = vset.pattern.permute.xlu1 %v1142_v7  ;;  %v31_v11 = vld [vmem:[%s1359_s4 + $0x10] sm:$0xff] }
   0x3   :  { %1037 = vmatpush3.bf16.msra.mxu0 %v55_v2  ;;  %v27_v6 = vld [vmem:[%s1358_s2] sm:$0xff]  ;;  %v302_v10 = vsel %vm53_vm0, %v968_v8, 0  ;;  %v972_v12 = vld [vmem:[%s1356_s0 + $0xc] sm:$0x7]  ;;  %v976_v14 = vld [vmem:[%s1356_s0 + $0x10] sm:$0x7] }
   0x4   :  { %1048 = vmatprep.subr.bf16.mxu0 %v1140_v0  ;;  %36 = vperm.xlu0 %1135, %v27_v6   ;;  %v408_v13 = vsel %vm53_vm0, %v972_v12, 0  ;;  %v514_v15 = vsel %vm53_vm0, %v976_v14, 0  ;;  %v980_v16 = vld [vmem:[%s1356_s0 + $0x14] sm:$0x7]  ;;  %v984_v18 = vld [vmem:[%s1356_s0 + $0x18] sm:$0x7] }
   0x5   :  { %v620_v17 = vsel %vm53_vm0, %v980_v16, 0  ;;  %v726_v19 = vsel %vm53_vm0, %v984_v18, 0  ;;  %v988_v20 = vld [vmem:[%s1356_s0 + $0x1c] sm:$0x7]  ;;  %v1236_v22 = vld [vmem:[%s1360_s3] sm:$0xff]   ;;  %vm131_vm3 = vcmask 130048  }
   0x6   :  { %1039 = vmatmul.mubr.msk.bf16.vlgmr.msra.gmra.mxu0 %vm49_vm2, %v1137_v3  ;;  %v832_v21 = vsel %vm53_vm0, %v988_v20, 0  ;;  %1044 = vmatprep.mubr.msk.bf16.mxu1 %vm131_vm3, %v1236_v22  ;;  %v29_v23 = vld [vmem:[%s1359_s4] sm:$0xff]  ;;  %v30_v24 = vld [vmem:[%s1359_s4 + $0x8] sm:$0xff]  ;;  %v32_v25 = vld [vmem:[%s1359_s4 + $0x18] sm:$0xff]  ;;  %vm949_vm4 = vcmask 257024  }
   0x7   :  { %1049 = vmatpush3.bf16.msra.mxu0 %v196_v5  ;;  %1050 = vmatprep.mubr.msk.bf16.mxu0 %vm1141_vm1, %v1140_v0  ;;  %v1259_v40 = vld [vmem:[%s1360_s3 + $0x8] sm:$0xff]  }
   0x8   :  { %1060 = vmatprep.subr.bf16.mxu0 %v1140_v0  ;;  %41 = vperm.xlu0 %1135, %v28_v9  }
   0x9   :  { %103 = vperm.xlu1 %1136, %v29_v23  }
   0xc   :  { %113 = vperm.xlu0 %1135, %v31_v11  }
   0xd   :  { %108 = vperm.xlu1 %1136, %v30_v24  }
   0xe   :  { %1051 = vmatmul.mubr.msk.bf16.vlgmr.msra.gmra.mxu0 %vm49_vm2, %v1137_v3 }
   0xf   :  { %1061 = vmatpush3.bf16.msra.mxu0 %v302_v10  ;;  %1062 = vmatprep.mubr.msk.bf16.mxu0 %vm1141_vm1, %v1140_v0 }
  0x10   :  { %1072 = vmatprep.subr.bf16.mxu0 %v1140_v0 }
  0x11   :  { %118 = vperm.xlu1 %1136, %v32_v25  }
  0x16   :  { %1063 = vmatmul.mubr.msk.bf16.vlgmr.msra.gmra.mxu0 %vm49_vm2, %v1137_v3 }
  0x17   :  { %1073 = vmatpush3.bf16.msra.mxu0 %v408_v13  ;;  %1074 = vmatprep.mubr.msk.bf16.mxu0 %vm1141_vm1, %v1140_v0 }
  0x18   :  { %1084 = vmatprep.subr.bf16.mxu0 %v1140_v0 }
  0x1e   :  { %1075 = vmatmul.mubr.msk.bf16.vlgmr.msra.gmra.mxu0 %vm49_vm2, %v1137_v3 }
  0x1f   :  { %1085 = vmatpush3.bf16.msra.mxu0 %v514_v15  ;;  %1086 = vmatprep.mubr.msk.bf16.mxu0 %vm1141_vm1, %v1140_v0 }
  0x20   :  { %1096 = vmatprep.subr.bf16.mxu0 %v1140_v0 }
  0x26   :  { %1087 = vmatmul.mubr.msk.bf16.vlgmr.msra.gmra.mxu0 %vm49_vm2, %v1137_v3 }
  0x27   :  { %1097 = vmatpush3.bf16.msra.mxu0 %v620_v17  ;;  %1098 = vmatprep.mubr.msk.bf16.mxu0 %vm1141_vm1, %v1140_v0 }
  0x28   :  { %1108 = vmatprep.subr.bf16.mxu0 %v1140_v0 }
  0x2e   :  { %1099 = vmatmul.mubr.msk.bf16.vlgmr.msra.gmra.mxu0 %vm49_vm2, %v1137_v3 }
  0x2f   :  { %1109 = vmatpush3.bf16.msra.mxu0 %v726_v19  ;;  %1110 = vmatprep.mubr.msk.bf16.mxu0 %vm1141_vm1, %v1140_v0 }
  0x30   :  { %1120 = vmatprep.subr.bf16.mxu0 %v1140_v0 }
  0x36   :  { %1111 = vmatmul.mubr.msk.bf16.vlgmr.msra.gmra.mxu0 %vm49_vm2, %v1137_v3 }
  0x37   :  { %1121 = vmatpush3.bf16.msra.mxu0 %v832_v21  ;;  %1122 = vmatprep.mubr.msk.bf16.mxu0 %vm1141_vm1, %v1140_v0 }
  0x3e   :  { %1123 = vmatmul.mubr.msk.bf16.vlgmr.msra.gmra.mxu0 %vm49_vm2, %v1137_v3 }
  0x7f   :  { %v1249_v26 = vpop.permute.xlu0 %36 }
  0x83   :  { %v1252_v30 = vpop.permute.xlu0 %41 }
  0xc6   :  { %v91_v27 = vpop.f32.mrf.mxu0 }
  0xc7   :  { %v92_v29 = vadd.f32 %v91_v27, %v1249_v26 }
  0xc8   :  { %v1040_v28 = vpop.f32.mrf.mxu0 }
  0xc9   :  { %v98_v34 = vmax.f32 %v92_v29, 0.0 }
  0xca   :  { %v94_v31 = vpop.f32.mrf.mxu0 }
  0xcb   :  { %v95_v32 = vadd.f32 %v94_v31, %v1252_v30 }
  0xcc   :  { %v1041_v33 = vpop.f32.mrf.mxu0 }
  0xcd   :  { %v99_v35 = vmax.f32 %v95_v32, 0.0 }
  0xce   :  { %v232_v36 = vpop.f32.mrf.mxu0 }
  0xcf   :  { %v100_v37 = vpack.c.bf16 %v99_v35, %v98_v34  ;;  %v233_v39 = vadd.f32 %v232_v36, %v1249_v26 }
  0xd0   :  { %v1052_v38 = vpop.f32.mrf.mxu0 }
  0xd1   :  { %1042 = vmatprep.subr.bf16.mxu1 %v100_v37  ;;  %v239_v44 = vmax.f32 %v233_v39, 0.0 }
  0xd2   :  { %1043 = vmatpush3.bf16.msra.mxu1 %v100_v37  ;;  %v235_v41 = vpop.f32.mrf.mxu0 }
  0xd3   :  { %v236_v42 = vadd.f32 %v235_v41, %v1252_v30 }
  0xd4   :  { %v1053_v43 = vpop.f32.mrf.mxu0 }
  0xd5   :  { %v240_v45 = vmax.f32 %v236_v42, 0.0  ;;  %1045 = vmatmul.mubr.msk.bf16.vlgmr.msra.gmra.mxu1 %vm131_vm3, %v1259_v40 }
  0xd6   :  { %v338_v46 = vpop.f32.mrf.mxu0  ;;  %1056 = vmatprep.mubr.msk.bf16.mxu1 %vm131_vm3, %v1236_v22 }
  0xd7   :  { %v241_v47 = vpack.c.bf16 %v240_v45, %v239_v44  ;;  %v339_v49 = vadd.f32 %v338_v46, %v1249_v26 }
  0xd8   :  { %v1064_v48 = vpop.f32.mrf.mxu0 }
  0xd9   :  { %1054 = vmatprep.subr.bf16.mxu1 %v241_v47  ;;  %v345_v53 = vmax.f32 %v339_v49, 0.0 }
  0xda   :  { %1055 = vmatpush3.bf16.msra.mxu1 %v241_v47  ;;  %v341_v50 = vpop.f32.mrf.mxu0 }
  0xdb   :  { %v342_v51 = vadd.f32 %v341_v50, %v1252_v30 }
  0xdc   :  { %v1065_v52 = vpop.f32.mrf.mxu0 }
  0xdd   :  { %v346_v54 = vmax.f32 %v342_v51, 0.0  ;;  %1057 = vmatmul.mubr.msk.bf16.vlgmr.msra.gmra.mxu1 %vm131_vm3, %v1259_v40  ;;  %v1304_v51 = vpop.permute.xlu1 %103 }
  0xde   :  { %v444_v55 = vpop.f32.mrf.mxu0  ;;  %1068 = vmatprep.mubr.msk.bf16.mxu1 %vm131_vm3, %v1236_v22 }
  0xdf   :  { %v347_v56 = vpack.c.bf16 %v346_v54, %v345_v53  ;;  %v445_v58 = vadd.f32 %v444_v55, %v1249_v26 }
  0xe0   :  { %v1076_v57 = vpop.f32.mrf.mxu0 }
  0xe1   :  { %1066 = vmatprep.subr.bf16.mxu1 %v347_v56  ;;  %v451_v62 = vmax.f32 %v445_v58, 0.0  ;;  %v1306_v54 = vpop.permute.xlu1 %108 }
  0xe2   :  { %1067 = vmatpush3.bf16.msra.mxu1 %v347_v56  ;;  %v447_v59 = vpop.f32.mrf.mxu0 }
  0xe3   :  { %v448_v60 = vadd.f32 %v447_v59, %v1252_v30 }
  0xe4   :  { %v1077_v61 = vpop.f32.mrf.mxu0 }
  0xe5   :  { %v452_v63 = vmax.f32 %v448_v60, 0.0  ;;  %1069 = vmatmul.mubr.msk.bf16.vlgmr.msra.gmra.mxu1 %vm131_vm3, %v1259_v40  ;;  %v1308_v57 = vpop.permute.xlu1 %118  ;;  %v1311_v60 = vpop.permute.xlu0 %113 }
  0xe6   :  { %v550_v0 = vpop.f32.mrf.mxu0  ;;  %1080 = vmatprep.mubr.msk.bf16.mxu1 %vm131_vm3, %v1236_v22 }
  0xe7   :  { %v453_v1 = vpack.c.bf16 %v452_v63, %v451_v62  ;;  %v551_v3 = vadd.f32 %v550_v0, %v1249_v26 }
  0xe8   :  { %v1088_v2 = vpop.f32.mrf.mxu0 }
  0xe9   :  { %1078 = vmatprep.subr.bf16.mxu1 %v453_v1  ;;  %v557_v7 = vmax.f32 %v551_v3, 0.0 }
  0xea   :  { %1079 = vmatpush3.bf16.msra.mxu1 %v453_v1  ;;  %v553_v4 = vpop.f32.mrf.mxu0 }
  0xeb   :  { %v554_v5 = vadd.f32 %v553_v4, %v1252_v30 }
  0xec   :  { %v1089_v6 = vpop.f32.mrf.mxu0 }
  0xed   :  { %v558_v8 = vmax.f32 %v554_v5, 0.0  ;;  %1081 = vmatmul.mubr.msk.bf16.vlgmr.msra.gmra.mxu1 %vm131_vm3, %v1259_v40 }
  0xee   :  { %v656_v9 = vpop.f32.mrf.mxu0  ;;  %1092 = vmatprep.mubr.msk.bf16.mxu1 %vm131_vm3, %v1236_v22 }
  0xef   :  { %v559_v10 = vpack.c.bf16 %v558_v8, %v557_v7  ;;  %v657_v12 = vadd.f32 %v656_v9, %v1249_v26 }
  0xf0   :  { %v1100_v11 = vpop.f32.mrf.mxu0 }
  0xf1   :  { %1090 = vmatprep.subr.bf16.mxu1 %v559_v10  ;;  %v663_v16 = vmax.f32 %v657_v12, 0.0 }
  0xf2   :  { %1091 = vmatpush3.bf16.msra.mxu1 %v559_v10  ;;  %v659_v13 = vpop.f32.mrf.mxu0 }
  0xf3   :  { %v660_v14 = vadd.f32 %v659_v13, %v1252_v30 }
  0xf4   :  { %v1101_v15 = vpop.f32.mrf.mxu0 }
  0xf5   :  { %v664_v17 = vmax.f32 %v660_v14, 0.0  ;;  %1093 = vmatmul.mubr.msk.bf16.vlgmr.msra.gmra.mxu1 %vm131_vm3, %v1259_v40 }
  0xf6   :  { %v762_v18 = vpop.f32.mrf.mxu0  ;;  %1104 = vmatprep.mubr.msk.bf16.mxu1 %vm131_vm3, %v1236_v22 }
  0xf7   :  { %v665_v19 = vpack.c.bf16 %v664_v17, %v663_v16  ;;  %v763_v21 = vadd.f32 %v762_v18, %v1249_v26 }
  0xf8   :  { %v1112_v20 = vpop.f32.mrf.mxu0 }
  0xf9   :  { %1102 = vmatprep.subr.bf16.mxu1 %v665_v19  ;;  %v769_v27 = vmax.f32 %v763_v21, 0.0 }
  0xfa   :  { %1103 = vmatpush3.bf16.msra.mxu1 %v665_v19  ;;  %v765_v23 = vpop.f32.mrf.mxu0 }
  0xfb   :  { %v766_v24 = vadd.f32 %v765_v23, %v1252_v30 }
  0xfc   :  { %v1113_v25 = vpop.f32.mrf.mxu0 }
  0xfd   :  { %v770_v28 = vmax.f32 %v766_v24, 0.0  ;;  %1105 = vmatmul.mubr.msk.bf16.vlgmr.msra.gmra.mxu1 %vm131_vm3, %v1259_v40 }
  0xfe   :  { %v868_v29 = vpop.f32.mrf.mxu0  ;;  %1116 = vmatprep.mubr.msk.bf16.mxu1 %vm131_vm3, %v1236_v22 }
  0xff   :  { %v771_v31 = vpack.c.bf16 %v770_v28, %v769_v27  ;;  %v869_v33 = vadd.f32 %v868_v29, %v1249_v26 }
 0x100   :  { %v1124_v32 = vpop.f32.mrf.mxu0 }
 0x101   :  { %1114 = vmatprep.subr.bf16.mxu1 %v771_v31  ;;  %v875_v37 = vmax.f32 %v869_v33, 0.0 }
 0x102   :  { %1115 = vmatpush3.bf16.msra.mxu1 %v771_v31  ;;  %v871_v34 = vpop.f32.mrf.mxu0 }
 0x103   :  { %v872_v35 = vadd.f32 %v871_v34, %v1252_v30 }
 0x104   :  { %v1125_v36 = vpop.f32.mrf.mxu0 }
 0x105   :  { %v876_v38 = vmax.f32 %v872_v35, 0.0  ;;  %1117 = vmatmul.mubr.msk.bf16.vlgmr.msra.gmra.mxu1 %vm131_vm3, %v1259_v40 }
 0x106   :  { %1128 = vmatprep.mubr.msk.bf16.mxu1 %vm131_vm3, %v1236_v22 }
 0x107   :  { %v877_v39 = vpack.c.bf16 %v876_v38, %v875_v37 }
 0x109   :  { %1126 = vmatprep.subr.bf16.mxu1 %v877_v39 }
 0x10a   :  { %1127 = vmatpush3.bf16.msra.mxu1 %v877_v39 }
 0x10d   :  { %1129 = vmatmul.mubr.msk.bf16.vlgmr.msra.gmra.mxu1 %vm131_vm3, %v1259_v40 }
 0x195   :  { %v1046_v26 = vpop.f32.mrf.mxu1 }
 0x196   :  { %v181_v1 = vadd.f32 %v1046_v26, %v1311_v60 }
 0x197   :  { %v172_v41 = vpop.f32.mrf.mxu1 }
 0x198   :  { %v173_v6 = vadd.f32 %v172_v41, %v1304_v51  ;;  %v189_v12 = vmax.f32 %v181_v1, 0.0 }
 0x199   :  { %v1047_v42 = vpop.f32.mrf.mxu1 }
 0x19a   :  { %v184_v61 = vadd.f32 %v1047_v42, %v1308_v57  ;;  %v187_v20 = vmax.f32 %v173_v6, 0.0 }
 0x19b   :  { %v175_v43 = vpop.f32.mrf.mxu1 }
 0x19c   :  { %v176_v2 = vadd.f32 %v175_v43, %v1306_v54  ;;  %v190_v7 = vmax.f32 %v184_v61, 0.0 }
 0x19d   :  { %v1058_v30 = vpop.f32.mrf.mxu1 }
 0x19e   :  { %v285_v62 = vadd.f32 %v1058_v30, %v1311_v60  ;;  %v188_v13 = vmax.f32 %v176_v2, 0.0  ;;  %v192_v21 = vpack.c.bf16 %v190_v7, %v189_v12 }
 0x19f   :  { %v276_v44 = vpop.f32.mrf.mxu1 }
 0x1a0   :  { %v277_v3 = vadd.f32 %v276_v44, %v1304_v51  ;;  %v293_v8 = vmax.f32 %v285_v62, 0.0  ;;  %v191_v31 = vpack.c.bf16 %v188_v13, %v187_v20 }
 0x1a1   :  { %v1059_v45 = vpop.f32.mrf.mxu1 }
 0x1a2   :  { %v288_v58 = vadd.f32 %v1059_v45, %v1308_v57  ;;  %v291_v14 = vmax.f32 %v277_v3, 0.0 }
 0x1a3   :  { %v279_v46 = vpop.f32.mrf.mxu1 }
 0x1a4   :  { %v280_v63 = vadd.f32 %v279_v46, %v1306_v54  ;;  %v294_v4 = vmax.f32 %v288_v58, 0.0 }
 0x1a5   :  { %v1070_v47 = vpop.f32.mrf.mxu1 }
 0x1a6   :  { %v292_v9 = vmax.f32 %v280_v63, 0.0  ;;  %v296_v15 = vpack.c.bf16 %v294_v4, %v293_v8  ;;  %v391_v17 = vadd.f32 %v1070_v47, %v1311_v60 }
 0x1a7   :  { %v382_v48 = vpop.f32.mrf.mxu1 }
 0x1a8   :  { %v295_v23 = vpack.c.bf16 %v292_v9, %v291_v14  ;;  %v383_v25 = vadd.f32 %v382_v48, %v1304_v51  ;;  %v298_v32 = vmax.bf16 %v296_v15, %v192_v21  ;;  %v399_v35 = vmax.f32 %v391_v17, 0.0 }
 0x1a9   :  { %v1071_v49 = vpop.f32.mrf.mxu1 }
 0x1aa   :  { %v394_v11 = vadd.f32 %v1071_v49, %v1308_v57  ;;  %v297_v39 = vmax.bf16 %v295_v23, %v191_v31  ;;  %v397_v30 = vmax.f32 %v383_v25, 0.0 }
 0x1ab   :  { %v385_v50 = vpop.f32.mrf.mxu1 }
 0x1ac   :  { %v386_v18 = vadd.f32 %v385_v50, %v1306_v54  ;;  %v400_v27 = vmax.f32 %v394_v11, 0.0 }
 0x1ad   :  { %v1082_v22 = vpop.f32.mrf.mxu1 }
 0x1ae   :  { %v497_v28 = vadd.f32 %v1082_v22, %v1311_v60  ;;  %v398_v36 = vmax.f32 %v386_v18, 0.0  ;;  %v402_v44 = vpack.c.bf16 %v400_v27, %v399_v35 }
 0x1af   :  { %v488_v52 = vpop.f32.mrf.mxu1 }
 0x1b0   :  { %v489_v37 = vadd.f32 %v488_v52, %v1304_v51  ;;  %v505_v45 = vmax.f32 %v497_v28, 0.0  ;;  %v401_v52 = vpack.c.bf16 %v398_v36, %v397_v30 }
 0x1b1   :  { %v1083_v53 = vpop.f32.mrf.mxu1 }
 0x1b2   :  { %v500_v19 = vadd.f32 %v1083_v53, %v1308_v57  ;;  %v503_v53 = vmax.f32 %v489_v37, 0.0  ;;  %v403_v8 = vmax.bf16 %v401_v52, %v297_v39 }
 0x1b3   :  { %v491_v40 = vpop.f32.mrf.mxu1 }
 0x1b4   :  { %v492_v29 = vadd.f32 %v491_v40, %v1306_v54  ;;  %v506_v38 = vmax.f32 %v500_v19, 0.0 }
 0x1b5   :  { %v1094_v55 = vpop.f32.mrf.mxu1 }
 0x1b6   :  { %v603_v26 = vadd.f32 %v1094_v55, %v1311_v60  ;;  %v504_v46 = vmax.f32 %v492_v29, 0.0  ;;  %v508_v40 = vpack.c.bf16 %v506_v38, %v505_v45 }
 0x1b7   :  { %v594_v56 = vpop.f32.mrf.mxu1 }
 0x1b8   :  { %v595_v47 = vadd.f32 %v594_v56, %v1304_v51  ;;  %v611_v58 = vmax.f32 %v603_v26, 0.0  ;;  %v507_v1 = vpack.c.bf16 %v504_v46, %v503_v53 }
 0x1b9   :  { %v1095_v59 = vpop.f32.mrf.mxu1 }
 0x1ba   :  { %v606_v33 = vadd.f32 %v1095_v59, %v1308_v57  ;;  %v609_v3 = vmax.f32 %v595_v47, 0.0  ;;  %v509_v19 = vmax.bf16 %v507_v1, %v403_v8 }
 0x1bb   :  { %v597_v0 = vpop.f32.mrf.mxu1 }
 0x1bc   :  { %v598_v41 = vadd.f32 %v597_v0, %v1306_v54  ;;  %v612_v48 = vmax.f32 %v606_v33, 0.0  ;;  %v404_v0 = vmax.bf16 %v402_v44, %v298_v32 }
 0x1bd   :  { %v1106_v5 = vpop.f32.mrf.mxu1 }
 0x1be   :  { %v709_v49 = vadd.f32 %v1106_v5, %v1311_v60  ;;  %v610_v59 = vmax.f32 %v598_v41, 0.0  ;;  %v614_v4 = vpack.c.bf16 %v612_v48, %v611_v58  ;;  %v510_v12 = vmax.bf16 %v508_v40, %v404_v0 }
 0x1bf   :  { %v700_v10 = vpop.f32.mrf.mxu1 }
 0x1c0   :  { %v701_v61 = vadd.f32 %v700_v10, %v1304_v51  ;;  %v717_v5 = vmax.f32 %v709_v49, 0.0  ;;  %v613_v13 = vpack.c.bf16 %v610_v59, %v609_v3  ;;  %v616_v20 = vmax.bf16 %v614_v4, %v510_v12 }
 0x1c1   :  { %v1107_v16 = vpop.f32.mrf.mxu1 }
 0x1c2   :  { %v712_v42 = vadd.f32 %v1107_v16, %v1308_v57  ;;  %v715_v10 = vmax.f32 %v701_v61, 0.0  ;;  %v615_v29 = vmax.bf16 %v613_v13, %v509_v19 }
 0x1c3   :  { %v703_v24 = vpop.f32.mrf.mxu1 }
 0x1c4   :  { %v704_v50 = vadd.f32 %v703_v24, %v1306_v54  ;;  %v718_v62 = vmax.f32 %v712_v42, 0.0 }
 0x1c5   :  { %v1118_v34 = vpop.f32.mrf.mxu1 }
 0x1c6   :  { %v815_v56 = vadd.f32 %v1118_v34, %v1311_v60  ;;  %v716_v6 = vmax.f32 %v704_v50, 0.0  ;;  %v720_v14 = vpack.c.bf16 %v718_v62, %v717_v5 }
 0x1c7   :  { %v806_v43 = vpop.f32.mrf.mxu1 }
 0x1c8   :  { %v807_v9 = vadd.f32 %v806_v43, %v1304_v51  ;;  %v823_v16 = vmax.f32 %v815_v56, 0.0  ;;  %v719_v21 = vpack.c.bf16 %v716_v6, %v715_v10  ;;  %v722_v31 = vmax.bf16 %v720_v14, %v616_v20 }
 0x1c9   :  { %v1119_v22 = vpop.f32.mrf.mxu1 }
 0x1ca   :  { %v818_v55 = vadd.f32 %v1119_v22, %v1308_v57  ;;  %v821_v24 = vmax.f32 %v807_v9, 0.0  ;;  %v721_v37 = vmax.bf16 %v719_v21, %v615_v29 }
 0x1cb   :  { %v809_v63 = vpop.f32.mrf.mxu1 }
 0x1cc   :  { %v810_v2 = vadd.f32 %v809_v63, %v1306_v54  ;;  %v824_v11 = vmax.f32 %v818_v55, 0.0 }
 0x1cd   :  { %v1130_v7 = vpop.f32.mrf.mxu1 }
 0x1ce   :  { %v822_v17 = vmax.f32 %v810_v2, 0.0  ;;  %v921_v18 = vadd.f32 %v1130_v7, %v1311_v60  ;;  %v826_v25 = vpack.c.bf16 %v824_v11, %v823_v16 }
 0x1cf   :  { %v912_v15 = vpop.f32.mrf.mxu1 }
 0x1d0   :  { %v913_v27 = vadd.f32 %v912_v15, %v1304_v51  ;;  %v825_v33 = vpack.c.bf16 %v822_v17, %v821_v24  ;;  %v929_v34 = vmax.f32 %v921_v18, 0.0  ;;  %v828_v60 = vmax.bf16 %v826_v25, %v722_v31 }
 0x1d1   :  { %v1131_v23 = vpop.f32.mrf.mxu1 }
 0x1d2   :  { %v924_v28 = vadd.f32 %v1131_v23, %v1308_v57  ;;  %v927_v38 = vmax.f32 %v913_v27, 0.0  ;;  %v827_v41 = vmax.bf16 %v825_v33, %v721_v37 }
 0x1d3   :  { %v915_v32 = vpop.f32.mrf.mxu1 }
 0x1d4   :  { %v930_v35 = vmax.f32 %v924_v28, 0.0  ;;  %v916_v36 = vadd.f32 %v915_v32, %v1306_v54 }
 0x1d6   :  { %v932_v39 = vpack.c.bf16 %v930_v35, %v929_v34  ;;  %v928_v26 = vmax.f32 %v916_v36, 0.0 }
 0x1d8   :  { %v934_v42 = vmax.bf16 %v932_v39, %v828_v60  ;;  %v931_v43 = vpack.c.bf16 %v928_v26, %v927_v38 }
 0x1da   :  { %v994_v51 = vcombine.low %v934_v42, %v934_v42  ;;  %v995_v30 = vcombine.high %v934_v42, %v934_v42  ;;  %v933_v57 = vmax.bf16 %v931_v43, %v827_v41 }
 0x1dc   :  { %952 = vst.msk [vmem:[%s1361_s5 + $0x8] sm:$0xf] %vm949_vm4, %v994_v51  ;;  %953 = vst.msk [vmem:[%s1361_s5 + $0xc] sm:$0xf] %vm949_vm4, %v995_v30  ;;  %v992_v54 = vcombine.low %v933_v57, %v933_v57  ;;  %v993_v44 = vcombine.high %v933_v57, %v933_v57 }
 0x1de   :  { %950 = vst.msk [vmem:[%s1361_s5] sm:$0xf] %vm949_vm4, %v992_v54  ;;  %951 = vst.msk [vmem:[%s1361_s5 + $0x4] sm:$0xf] %vm949_vm4, %v993_v44 }

// kernel: a_call__.3
= control target key start
LH: loop header
LB: loop body
LE: loop exit
PB: predicated region body
PF: predicated region fallthrough
CT: control target
= control target key end

     0   :  { %vm83_vm0 = vcmask 1042432   ;;  %vm76_vm1 = vcmask 48128   ;;  %v3036_v2 = vmov 0   ;;  %vm202_vm2 = vcmask 261120   ;;  %s3935_s0 = inlined_call_operand.vmem [shape: bf16[16,6,32], index: 0, kind: input, shape index: {}]   ;;  %s3936_s1 = inlined_call_operand.vmem [shape: bf16[32,6], index: 1, kind: input, shape index: {}]   ;;  %s3937_s2 = inlined_call_operand.vmem [shape: f32[32,1], index: 2, kind: input, shape index: {}]   ;;  %s3938_s4 = inlined_call_operand.vmem [shape: f32[64,1], index: 4, kind: input, shape index: {}]   ;;  %s3939_s3 = inlined_call_operand.vmem [shape: bf16[64,32], index: 3, kind: input, shape index: {}]   ;;  %s3940_s5 = inlined_call_operand.vmem [shape: bf16[64,32], index: 5, kind: output, shape index: {}]  }
   0x1   :  { %v45_v0 = vld [vmem:[%s3935_s0] sm:$0x7]  ;;  %v2460_v1 = vld [vmem:[%s3935_s0 + $0x4] sm:$0x7]  ;;  %3022 = vset.pattern.permute.xlu0 %v3036_v2  ;;  %3023 = vset.pattern.permute.xlu1 %v3036_v2  ;;  %v3085_v6 = vld [vmem:[%s3936_s1 + $0x8] sm:$0xff]   ;;  %vm2435_vm3 = vcmask 257024  }
   0x2   :  { %3005 = vmatprep.subr.msk.bf16.mxu1 %vm83_vm0, %v45_v0  ;;  %3006 = vmatprep.subr.msk.bf16.mxu0 %vm83_vm0, %v2460_v1  ;;  %v85_v3 = vsel %vm83_vm0, %v45_v0, 0  ;;  %v295_v4 = vsel %vm83_vm0, %v2460_v1, 0  ;;  %v3080_v5 = vld [vmem:[%s3936_s1] sm:$0xff]   ;;  %v35_v7 = vld [vmem:[%s3937_s2 + $0x10] sm:$0xff]  ;;  %v36_v9 = vld [vmem:[%s3937_s2 + $0x18] sm:$0xff] }
   0x3   :  { %2718 = vmatpush3.bf16.msra.mxu1 %v85_v3  ;;  %2736 = vmatpush3.bf16.msra.mxu0 %v295_v4  ;;  %v33_v8 = vld [vmem:[%s3937_s2] sm:$0xff]  ;;  %v34_v10 = vld [vmem:[%s3937_s2 + $0x8] sm:$0xff]  ;;  %v39_v13 = vld [vmem:[%s3938_s4 + $0x10] sm:$0xff] }
   0x4   :  { %2719 = vmatprep.mubr.msk.bf16.mxu1 %vm76_vm1, %v3080_v5  ;;  %2737 = vmatprep.mubr.msk.bf16.mxu0 %vm76_vm1, %v3080_v5  ;;  %v37_v11 = vld [vmem:[%s3938_s4] sm:$0xff]  ;;  %v38_v12 = vld [vmem:[%s3938_s4 + $0x8] sm:$0xff]  ;;  %v40_v14 = vld [vmem:[%s3938_s4 + $0x18] sm:$0xff] }
   0x5   :  { %58 = vperm.xlu0 %3022, %v35_v7   ;;  %48 = vperm.xlu1 %3023, %v33_v8   ;;  %v41_v15 = vld [vmem:[%s3938_s4 + $0x20] sm:$0xff]  ;;  %v42_v16 = vld [vmem:[%s3938_s4 + $0x28] sm:$0xff]  ;;  %v43_v17 = vld [vmem:[%s3938_s4 + $0x30] sm:$0xff] }
   0x6   :  { %2720 = vmatmul.mubr.msk.bf16.vlgmr.msra.gmra.mxu1 %vm76_vm1, %v3085_v6  ;;  %2738 = vmatmul.mubr.msk.bf16.vlgmr.msra.gmra.mxu0 %vm76_vm1, %v3085_v6  ;;  %v44_v18 = vld [vmem:[%s3938_s4 + $0x38] sm:$0xff]  ;;  %v3134_v19 = vld [vmem:[%s3939_s3] sm:$0xff]   ;;  %v2467_v52 = vld [vmem:[%s3935_s0 + $0x8] sm:$0x7] }
   0x7   :  { %2727 = vmatprep.mubr.msk.bf16.mxu1 %vm202_vm2, %v3134_v19  ;;  %2745 = vmatprep.mubr.msk.bf16.mxu0 %vm202_vm2, %v3134_v19  ;;  %v2474_v53 = vld [vmem:[%s3935_s0 + $0xc] sm:$0x7]  ;;  %v436_v55 = vsel %vm83_vm0, %v2467_v52, 0  ;;  %v3174_v57 = vld [vmem:[%s3939_s3 + $0x10] sm:$0xff]   ;;  %v3187_v58 = vld [vmem:[%s3939_s3 + $0x18] sm:$0xff]  }
   0x8   :  { %v3165_v54 = vld [vmem:[%s3939_s3 + $0x8] sm:$0xff]   ;;  %v577_v56 = vsel %vm83_vm0, %v2474_v53, 0 }
   0x9   :  { %63 = vperm.xlu0 %3022, %v36_v9   ;;  %53 = vperm.xlu1 %3023, %v34_v10  }
   0xd   :  { %144 = vperm.xlu0 %3022, %v37_v11   ;;  %149 = vperm.xlu1 %3023, %v38_v12  }
  0x11   :  { %154 = vperm.xlu0 %3022, %v39_v13   ;;  %159 = vperm.xlu1 %3023, %v40_v14  }
  0x15   :  { %164 = vperm.xlu0 %3022, %v41_v15   ;;  %169 = vperm.xlu1 %3023, %v42_v16  }
  0x19   :  { %174 = vperm.xlu0 %3022, %v43_v17   ;;  %179 = vperm.xlu1 %3023, %v44_v18  }
  0x80   :  { %v3140_v20 = vpop.permute.xlu0 %58  ;;  %v3142_v21 = vpop.permute.xlu1 %48 }
  0x84   :  { %v3146_v28 = vpop.permute.xlu0 %63  ;;  %v3150_v33 = vpop.permute.xlu1 %53 }
  0x88   :  { %v3205_v59 = vpop.permute.xlu0 %144  ;;  %v3207_v60 = vpop.permute.xlu1 %149 }
  0x8c   :  { %v3209_v61 = vpop.permute.xlu0 %154  ;;  %v3211_v62 = vpop.permute.xlu1 %159 }
  0x90   :  { %v3215_v7 = vpop.permute.xlu0 %164  ;;  %v3219_v12 = vpop.permute.xlu1 %169 }
  0xc6   :  { %v2721_v22 = vpop.f32.mrf.mxu1  ;;  %v2739_v23 = vpop.f32.mrf.mxu0 }
  0xc7   :  { %v130_v24 = vadd.f32 %v2721_v22, %v3140_v20  ;;  %v340_v25 = vadd.f32 %v2739_v23, %v3140_v20 }
  0xc8   :  { %v121_v26 = vpop.f32.mrf.mxu1  ;;  %v331_v27 = vpop.f32.mrf.mxu0 }
  0xc9   :  { %v122_v29 = vadd.f32 %v121_v26, %v3142_v21  ;;  %v332_v30 = vadd.f32 %v331_v27, %v3142_v21  ;;  %v138_v36 = vmax.f32 %v130_v24, 0.0  ;;  %v348_v37 = vmax.f32 %v340_v25, 0.0 }
  0xca   :  { %v2722_v31 = vpop.f32.mrf.mxu1  ;;  %v2740_v32 = vpop.f32.mrf.mxu0 }
  0xcb   :  { %v133_v34 = vadd.f32 %v2722_v31, %v3146_v28  ;;  %v343_v35 = vadd.f32 %v2740_v32, %v3146_v28  ;;  %v136_v44 = vmax.f32 %v122_v29, 0.0  ;;  %v346_v45 = vmax.f32 %v332_v30, 0.0  ;;  %v3225_v31 = vpop.permute.xlu0 %174 }
  0xcc   :  { %v124_v38 = vpop.f32.mrf.mxu1  ;;  %v334_v39 = vpop.f32.mrf.mxu0 }
  0xcd   :  { %v139_v40 = vmax.f32 %v133_v34, 0.0  ;;  %v349_v41 = vmax.f32 %v343_v35, 0.0  ;;  %v125_v42 = vadd.f32 %v124_v38, %v3150_v33  ;;  %v335_v43 = vadd.f32 %v334_v39, %v3150_v33 }
  0xcf   :  { %v141_v46 = vpack.c.bf16 %v139_v40, %v138_v36  ;;  %v351_v47 = vpack.c.bf16 %v349_v41, %v348_v37  ;;  %v137_v48 = vmax.f32 %v125_v42, 0.0  ;;  %v347_v49 = vmax.f32 %v335_v43, 0.0  ;;  %v3233_v41 = vpop.permute.xlu1 %179 }
  0xd1   :  { %v140_v50 = vpack.c.bf16 %v137_v48, %v136_v44  ;;  %v350_v51 = vpack.c.bf16 %v347_v49, %v346_v45  ;;  %2723 = vmatprep.subr.bf16.mxu1 %v141_v46  ;;  %2741 = vmatprep.subr.bf16.mxu0 %v351_v47 }
  0xd2   :  { %2724 = vmatpush3.bf16.msra.mxu1 %v141_v46  ;;  %2742 = vmatpush3.bf16.msra.mxu0 %v351_v47 }
  0xd3   :  { %2725 = vmatprep.subr.bf16.mxu1 %v140_v50  ;;  %2743 = vmatprep.subr.bf16.mxu0 %v350_v51 }
  0xd6   :  { %2726 = vmatpush3.bf16.msra.mxu1 %v140_v50  ;;  %2744 = vmatpush3.bf16.msra.mxu0 %v350_v51 }
  0xd7   :  { %3007 = vmatprep.subr.msk.bf16.mxu1 %vm83_vm0, %v2467_v52  ;;  %3008 = vmatprep.subr.msk.bf16.mxu0 %vm83_vm0, %v2474_v53 }
  0xd9   :  { %2728 = vmatmul.mubr.msk.bf16.vlgmr.msra.gmra.mxu1 %vm202_vm2, %v3165_v54  ;;  %2746 = vmatmul.mubr.msk.bf16.vlgmr.msra.gmra.mxu0 %vm202_vm2, %v3165_v54 }
  0xda   :  { %2754 = vmatpush3.bf16.msra.mxu1 %v436_v55  ;;  %2772 = vmatpush3.bf16.msra.mxu0 %v577_v56 }
  0xdb   :  { %2731 = vmatprep.mubr.msk.bf16.mxu1 %vm202_vm2, %v3174_v57  ;;  %2749 = vmatprep.mubr.msk.bf16.mxu0 %vm202_vm2, %v3174_v57 }
  0xe1   :  { %2732 = vmatmul.mubr.msk.bf16.gmra.mxu1 %vm202_vm2, %v3187_v58  ;;  %2750 = vmatmul.mubr.msk.bf16.gmra.mxu0 %vm202_vm2, %v3187_v58 }
  0xe2   :  { %2755 = vmatprep.mubr.msk.bf16.mxu1 %vm76_vm1, %v3080_v5  ;;  %2773 = vmatprep.mubr.msk.bf16.mxu0 %vm76_vm1, %v3080_v5 }
  0xe9   :  { %2756 = vmatmul.mubr.msk.bf16.vlgmr.msra.gmra.mxu1 %vm76_vm1, %v3085_v6  ;;  %2774 = vmatmul.mubr.msk.bf16.vlgmr.msra.gmra.mxu0 %vm76_vm1, %v3085_v6 }
  0xea   :  { %2763 = vmatprep.mubr.msk.bf16.mxu1 %vm202_vm2, %v3134_v19  ;;  %2781 = vmatprep.mubr.msk.bf16.mxu0 %vm202_vm2, %v3134_v19 }
 0x199   :  { %v2729_v63 = vpop.f32.mrf.mxu1  ;;  %v2747_v0 = vpop.f32.mrf.mxu0 }
 0x19a   :  { %v258_v1 = vadd.f32 %v2729_v63, %v3209_v61  ;;  %v395_v2 = vadd.f32 %v2747_v0, %v3209_v61 }
 0x19b   :  { %v249_v3 = vpop.f32.mrf.mxu1  ;;  %v386_v4 = vpop.f32.mrf.mxu0 }
 0x19c   :  { %v250_v8 = vadd.f32 %v249_v3, %v3205_v59  ;;  %v387_v9 = vadd.f32 %v386_v4, %v3205_v59  ;;  %v282_v15 = vmax.f32 %v258_v1, 0.0  ;;  %v419_v16 = vmax.f32 %v395_v2, 0.0 }
 0x19d   :  { %v2730_v10 = vpop.f32.mrf.mxu1  ;;  %v2748_v11 = vpop.f32.mrf.mxu0 }
 0x19e   :  { %v261_v13 = vadd.f32 %v2730_v10, %v3211_v62  ;;  %v398_v14 = vadd.f32 %v2748_v11, %v3211_v62  ;;  %v280_v26 = vmax.f32 %v250_v8, 0.0  ;;  %v417_v27 = vmax.f32 %v387_v9, 0.0 }
 0x19f   :  { %v252_v17 = vpop.f32.mrf.mxu1  ;;  %v389_v18 = vpop.f32.mrf.mxu0 }
 0x1a0   :  { %v283_v22 = vmax.f32 %v261_v13, 0.0  ;;  %v420_v23 = vmax.f32 %v398_v14, 0.0  ;;  %v253_v24 = vadd.f32 %v252_v17, %v3207_v60  ;;  %v390_v25 = vadd.f32 %v389_v18, %v3207_v60 }
 0x1a1   :  { %v2733_v29 = vpop.f32.mrf.mxu1  ;;  %v2751_v30 = vpop.f32.mrf.mxu0 }
 0x1a2   :  { %v3227_v32 = vpack.c.bf16 %v283_v22, %v282_v15  ;;  %v3229_v34 = vpack.c.bf16 %v420_v23, %v419_v16  ;;  %v281_v35 = vmax.f32 %v253_v24, 0.0  ;;  %v418_v36 = vmax.f32 %v390_v25, 0.0 }
 0x1a3   :  { %v274_v37 = vadd.f32 %v2733_v29, %v3225_v31  ;;  %v411_v38 = vadd.f32 %v2751_v30, %v3225_v31  ;;  %v265_v39 = vpop.f32.mrf.mxu1  ;;  %v402_v40 = vpop.f32.mrf.mxu0 }
 0x1a4   :  { %v430_v42 = vmax.bf16 %v3229_v34, %v3227_v32  ;;  %v3237_v43 = vpack.c.bf16 %v281_v35, %v280_v26  ;;  %v3239_v44 = vpack.c.bf16 %v418_v36, %v417_v27  ;;  %v266_v45 = vadd.f32 %v265_v39, %v3215_v7 }
 0x1a5   :  { %v403_v46 = vadd.f32 %v402_v40, %v3215_v7  ;;  %v2734_v47 = vpop.f32.mrf.mxu1  ;;  %v2752_v48 = vpop.f32.mrf.mxu0  ;;  %v286_v52 = vmax.f32 %v274_v37, 0.0  ;;  %v423_v53 = vmax.f32 %v411_v38, 0.0 }
 0x1a6   :  { %v429_v49 = vmax.bf16 %v3239_v44, %v3237_v43  ;;  %v277_v50 = vadd.f32 %v2734_v47, %v3233_v41  ;;  %v414_v51 = vadd.f32 %v2752_v48, %v3233_v41  ;;  %v284_v3 = vmax.f32 %v266_v45, 0.0 }
 0x1a7   :  { %v268_v55 = vpop.f32.mrf.mxu1  ;;  %v405_v56 = vpop.f32.mrf.mxu0  ;;  %v421_v4 = vmax.f32 %v403_v46, 0.0 }
 0x1a8   :  { %v287_v63 = vmax.f32 %v277_v50, 0.0  ;;  %v424_v0 = vmax.f32 %v414_v51, 0.0  ;;  %v269_v1 = vadd.f32 %v268_v55, %v3219_v12  ;;  %v406_v2 = vadd.f32 %v405_v56, %v3219_v12 }
 0x1a9   :  { %v2757_v8 = vpop.f32.mrf.mxu1  ;;  %v2775_v9 = vpop.f32.mrf.mxu0 }
 0x1aa   :  { %v3249_v10 = vpack.c.bf16 %v287_v63, %v286_v52  ;;  %v3251_v11 = vpack.c.bf16 %v424_v0, %v423_v53  ;;  %v285_v13 = vmax.f32 %v269_v1, 0.0  ;;  %v422_v14 = vmax.f32 %v406_v2, 0.0  ;;  %v2481_v1 = vld [vmem:[%s3935_s0 + $0x10] sm:$0x7]  ;;  %v2488_v2 = vld [vmem:[%s3935_s0 + $0x14] sm:$0x7] }
 0x1ab   :  { %v481_v15 = vadd.f32 %v2757_v8, %v3140_v20  ;;  %v622_v16 = vadd.f32 %v2775_v9, %v3140_v20  ;;  %v472_v17 = vpop.f32.mrf.mxu1  ;;  %v613_v18 = vpop.f32.mrf.mxu0 }
 0x1ac   :  { %v432_v22 = vmax.bf16 %v3251_v11, %v3249_v10  ;;  %v3257_v23 = vpack.c.bf16 %v285_v13, %v284_v3  ;;  %v3259_v24 = vpack.c.bf16 %v422_v14, %v421_v4  ;;  %v473_v25 = vadd.f32 %v472_v17, %v3142_v21 }
 0x1ad   :  { %v614_v26 = vadd.f32 %v613_v18, %v3142_v21  ;;  %v2758_v27 = vpop.f32.mrf.mxu1  ;;  %v2776_v29 = vpop.f32.mrf.mxu0  ;;  %v489_v37 = vmax.f32 %v481_v15, 0.0  ;;  %v630_v38 = vmax.f32 %v622_v16, 0.0  ;;  %v718_v3 = vsel %vm83_vm0, %v2481_v1, 0 }
 0x1ae   :  { %v431_v30 = vmax.bf16 %v3259_v24, %v3257_v23  ;;  %v484_v35 = vadd.f32 %v2758_v27, %v3146_v28  ;;  %v625_v36 = vadd.f32 %v2776_v29, %v3146_v28  ;;  %v487_v50 = vmax.f32 %v473_v25, 0.0 }
 0x1af   :  { %v475_v39 = vpop.f32.mrf.mxu1  ;;  %v616_v40 = vpop.f32.mrf.mxu0  ;;  %v628_v51 = vmax.f32 %v614_v26, 0.0  ;;  %v859_v4 = vsel %vm83_vm0, %v2488_v2, 0 }
 0x1b0   :  { %v490_v45 = vmax.f32 %v484_v35, 0.0  ;;  %v631_v46 = vmax.f32 %v625_v36, 0.0  ;;  %v476_v47 = vadd.f32 %v475_v39, %v3150_v33  ;;  %v617_v48 = vadd.f32 %v616_v40, %v3150_v33 }
 0x1b2   :  { %v492_v52 = vpack.c.bf16 %v490_v45, %v489_v37  ;;  %v633_v53 = vpack.c.bf16 %v631_v46, %v630_v38  ;;  %v488_v55 = vmax.f32 %v476_v47, 0.0  ;;  %v629_v56 = vmax.f32 %v617_v48, 0.0 }
 0x1b4   :  { %v491_v63 = vpack.c.bf16 %v488_v55, %v487_v50  ;;  %v632_v0 = vpack.c.bf16 %v629_v56, %v628_v51  ;;  %2759 = vmatprep.subr.bf16.mxu1 %v492_v52  ;;  %2777 = vmatprep.subr.bf16.mxu0 %v633_v53 }
 0x1b5   :  { %2760 = vmatpush3.bf16.msra.mxu1 %v492_v52  ;;  %2778 = vmatpush3.bf16.msra.mxu0 %v633_v53 }
 0x1b6   :  { %2761 = vmatprep.subr.bf16.mxu1 %v491_v63  ;;  %2779 = vmatprep.subr.bf16.mxu0 %v632_v0 }
 0x1b9   :  { %2762 = vmatpush3.bf16.msra.mxu1 %v491_v63  ;;  %2780 = vmatpush3.bf16.msra.mxu0 %v632_v0 }
 0x1ba   :  { %3009 = vmatprep.subr.msk.bf16.mxu1 %vm83_vm0, %v2481_v1  ;;  %3010 = vmatprep.subr.msk.bf16.mxu0 %vm83_vm0, %v2488_v2 }
 0x1bc   :  { %2764 = vmatmul.mubr.msk.bf16.vlgmr.msra.gmra.mxu1 %vm202_vm2, %v3165_v54  ;;  %2782 = vmatmul.mubr.msk.bf16.vlgmr.msra.gmra.mxu0 %vm202_vm2, %v3165_v54 }
 0x1bd   :  { %2790 = vmatpush3.bf16.msra.mxu1 %v718_v3  ;;  %2808 = vmatpush3.bf16.msra.mxu0 %v859_v4 }
 0x1be   :  { %2767 = vmatprep.mubr.msk.bf16.mxu1 %vm202_vm2, %v3174_v57  ;;  %2785 = vmatprep.mubr.msk.bf16.mxu0 %vm202_vm2, %v3174_v57 }
 0x1c4   :  { %2768 = vmatmul.mubr.msk.bf16.gmra.mxu1 %vm202_vm2, %v3187_v58  ;;  %2786 = vmatmul.mubr.msk.bf16.gmra.mxu0 %vm202_vm2, %v3187_v58 }
 0x1c5   :  { %2791 = vmatprep.mubr.msk.bf16.mxu1 %vm76_vm1, %v3080_v5  ;;  %2809 = vmatprep.mubr.msk.bf16.mxu0 %vm76_vm1, %v3080_v5 }
 0x1cc   :  { %2792 = vmatmul.mubr.msk.bf16.vlgmr.msra.gmra.mxu1 %vm76_vm1, %v3085_v6  ;;  %2810 = vmatmul.mubr.msk.bf16.vlgmr.msra.gmra.mxu0 %vm76_vm1, %v3085_v6 }
 0x1cd   :  { %2799 = vmatprep.mubr.msk.bf16.mxu1 %vm202_vm2, %v3134_v19  ;;  %2817 = vmatprep.mubr.msk.bf16.mxu0 %vm202_vm2, %v3134_v19 }
 0x27c   :  { %v2765_v8 = vpop.f32.mrf.mxu1  ;;  %v2783_v9 = vpop.f32.mrf.mxu0 }
 0x27d   :  { %v536_v13 = vadd.f32 %v2765_v8, %v3209_v61  ;;  %v677_v14 = vadd.f32 %v2783_v9, %v3209_v61 }
 0x27e   :  { %v527_v15 = vpop.f32.mrf.mxu1  ;;  %v668_v16 = vpop.f32.mrf.mxu0 }
 0x27f   :  { %v528_v17 = vadd.f32 %v527_v15, %v3205_v59  ;;  %v669_v18 = vadd.f32 %v668_v16, %v3205_v59  ;;  %v560_v35 = vmax.f32 %v536_v13, 0.0  ;;  %v701_v36 = vmax.f32 %v677_v14, 0.0 }
 0x280   :  { %v2766_v25 = vpop.f32.mrf.mxu1  ;;  %v2784_v26 = vpop.f32.mrf.mxu0 }
 0x281   :  { %v539_v27 = vadd.f32 %v2766_v25, %v3211_v62  ;;  %v680_v29 = vadd.f32 %v2784_v26, %v3211_v62  ;;  %v558_v47 = vmax.f32 %v528_v17, 0.0  ;;  %v699_v48 = vmax.f32 %v669_v18, 0.0 }
 0x282   :  { %v530_v37 = vpop.f32.mrf.mxu1  ;;  %v671_v38 = vpop.f32.mrf.mxu0 }
 0x283   :  { %v561_v39 = vmax.f32 %v539_v27, 0.0  ;;  %v702_v40 = vmax.f32 %v680_v29, 0.0  ;;  %v531_v45 = vadd.f32 %v530_v37, %v3207_v60  ;;  %v672_v46 = vadd.f32 %v671_v38, %v3207_v60 }
 0x284   :  { %v2769_v50 = vpop.f32.mrf.mxu1  ;;  %v2787_v51 = vpop.f32.mrf.mxu0 }
 0x285   :  { %v567_v52 = vpack.c.bf16 %v561_v39, %v560_v35  ;;  %v3311_v53 = vpack.c.bf16 %v702_v40, %v701_v36  ;;  %v559_v55 = vmax.f32 %v531_v45, 0.0  ;;  %v700_v56 = vmax.f32 %v672_v46, 0.0 }
 0x286   :  { %v552_v63 = vadd.f32 %v2769_v50, %v3225_v31  ;;  %v543_v0 = vpop.f32.mrf.mxu1  ;;  %v684_v1 = vpop.f32.mrf.mxu0  ;;  %v693_v8 = vadd.f32 %v2787_v51, %v3225_v31 }
 0x287   :  { %v3317_v2 = vmax.bf16 %v567_v52, %v430_v42  ;;  %v566_v3 = vpack.c.bf16 %v559_v55, %v558_v47  ;;  %v3319_v4 = vpack.c.bf16 %v700_v56, %v699_v48  ;;  %v544_v9 = vadd.f32 %v543_v0, %v3215_v7 }
 0x288   :  { %v2770_v13 = vpop.f32.mrf.mxu1  ;;  %v2788_v14 = vpop.f32.mrf.mxu0  ;;  %v685_v32 = vadd.f32 %v684_v1, %v3215_v7  ;;  %v564_v42 = vmax.f32 %v552_v63, 0.0  ;;  %v705_v43 = vmax.f32 %v693_v8, 0.0 }
 0x289   :  { %v712_v15 = vmax.bf16 %v3311_v53, %v3317_v2  ;;  %v3328_v16 = vmax.bf16 %v566_v3, %v429_v49  ;;  %v555_v34 = vadd.f32 %v2770_v13, %v3233_v41  ;;  %v696_v17 = vadd.f32 %v2788_v14, %v3233_v41 }
 0x28a   :  { %v546_v18 = vpop.f32.mrf.mxu1  ;;  %v687_v25 = vpop.f32.mrf.mxu0  ;;  %v562_v44 = vmax.f32 %v544_v9, 0.0  ;;  %v703_v38 = vmax.f32 %v685_v32, 0.0 }
 0x28b   :  { %v711_v26 = vmax.bf16 %v3319_v4, %v3328_v16  ;;  %v565_v27 = vmax.f32 %v555_v34, 0.0  ;;  %v547_v29 = vadd.f32 %v546_v18, %v3219_v12  ;;  %v688_v35 = vadd.f32 %v687_v25, %v3219_v12 }
 0x28c   :  { %v706_v49 = vmax.f32 %v696_v17, 0.0  ;;  %v2793_v36 = vpop.f32.mrf.mxu1  ;;  %v2811_v37 = vpop.f32.mrf.mxu0 }
 0x28d   :  { %v569_v39 = vpack.c.bf16 %v565_v27, %v564_v42  ;;  %v563_v40 = vmax.f32 %v547_v29, 0.0  ;;  %v704_v45 = vmax.f32 %v688_v35, 0.0  ;;  %v763_v47 = vadd.f32 %v2793_v36, %v3140_v20  ;;  %v2502_v36 = vld [vmem:[%s3935_s0 + $0x1c] sm:$0x7] }
 0x28e   :  { %v3337_v46 = vpack.c.bf16 %v706_v49, %v705_v43  ;;  %v904_v48 = vadd.f32 %v2811_v37, %v3140_v20  ;;  %v754_v50 = vpop.f32.mrf.mxu1  ;;  %v895_v51 = vpop.f32.mrf.mxu0  ;;  %v2495_v49 = vld [vmem:[%s3935_s0 + $0x18] sm:$0x7] }
 0x28f   :  { %v3344_v52 = vmax.bf16 %v569_v39, %v432_v22  ;;  %v568_v55 = vpack.c.bf16 %v563_v40, %v562_v44  ;;  %v3346_v56 = vpack.c.bf16 %v704_v45, %v703_v38  ;;  %v755_v63 = vadd.f32 %v754_v50, %v3142_v21 }
 0x290   :  { %v2794_v0 = vpop.f32.mrf.mxu1  ;;  %v2812_v1 = vpop.f32.mrf.mxu0  ;;  %v771_v11 = vmax.f32 %v763_v47, 0.0  ;;  %v912_v22 = vmax.f32 %v904_v48, 0.0  ;;  %v896_v13 = vadd.f32 %v895_v51, %v3142_v21  ;;  %v1000_v37 = vsel %vm83_vm0, %v2495_v49, 0 }
 0x291   :  { %v714_v3 = vmax.bf16 %v3337_v46, %v3344_v52  ;;  %v3354_v8 = vmax.bf16 %v568_v55, %v431_v30  ;;  %v766_v9 = vadd.f32 %v2794_v0, %v3146_v28  ;;  %v907_v10 = vadd.f32 %v2812_v1, %v3146_v28 }
 0x292   :  { %v757_v14 = vpop.f32.mrf.mxu1  ;;  %v898_v32 = vpop.f32.mrf.mxu0  ;;  %v769_v24 = vmax.f32 %v755_v63, 0.0  ;;  %v910_v29 = vmax.f32 %v896_v13, 0.0  ;;  %v1141_v38 = vsel %vm83_vm0, %v2502_v36, 0 }
 0x293   :  { %v713_v34 = vmax.bf16 %v3346_v56, %v3354_v8  ;;  %v772_v42 = vmax.f32 %v766_v9, 0.0  ;;  %v913_v17 = vmax.f32 %v907_v10, 0.0  ;;  %v758_v18 = vadd.f32 %v757_v14, %v3150_v33 }
 0x294   :  { %v899_v23 = vadd.f32 %v898_v32, %v3150_v33 }
 0x295   :  { %v774_v30 = vpack.c.bf16 %v772_v42, %v771_v11  ;;  %v915_v25 = vpack.c.bf16 %v913_v17, %v912_v22  ;;  %v770_v27 = vmax.f32 %v758_v18, 0.0 }
 0x296   :  { %v911_v35 = vmax.f32 %v899_v23, 0.0 }
 0x297   :  { %v773_v43 = vpack.c.bf16 %v770_v27, %v769_v24  ;;  %2795 = vmatprep.subr.bf16.mxu1 %v774_v30  ;;  %2813 = vmatprep.subr.bf16.mxu0 %v915_v25 }
 0x298   :  { %v914_v44 = vpack.c.bf16 %v911_v35, %v910_v29  ;;  %2796 = vmatpush3.bf16.msra.mxu1 %v774_v30  ;;  %2814 = vmatpush3.bf16.msra.mxu0 %v915_v25 }
 0x299   :  { %2797 = vmatprep.subr.bf16.mxu1 %v773_v43 }
 0x29a   :  { %2815 = vmatprep.subr.bf16.mxu0 %v914_v44 }
 0x29c   :  { %2798 = vmatpush3.bf16.msra.mxu1 %v773_v43  ;;  %2816 = vmatpush3.bf16.msra.mxu0 %v914_v44 }
 0x29d   :  { %3011 = vmatprep.subr.msk.bf16.mxu1 %vm83_vm0, %v2495_v49  ;;  %3012 = vmatprep.subr.msk.bf16.mxu0 %vm83_vm0, %v2502_v36 }
 0x29f   :  { %2800 = vmatmul.mubr.msk.bf16.vlgmr.msra.gmra.mxu1 %vm202_vm2, %v3165_v54  ;;  %2818 = vmatmul.mubr.msk.bf16.vlgmr.msra.gmra.mxu0 %vm202_vm2, %v3165_v54 }
 0x2a0   :  { %2826 = vmatpush3.bf16.msra.mxu1 %v1000_v37  ;;  %2844 = vmatpush3.bf16.msra.mxu0 %v1141_v38 }
 0x2a1   :  { %2803 = vmatprep.mubr.msk.bf16.mxu1 %vm202_vm2, %v3174_v57  ;;  %2821 = vmatprep.mubr.msk.bf16.mxu0 %vm202_vm2, %v3174_v57 }
 0x2a7   :  { %2804 = vmatmul.mubr.msk.bf16.gmra.mxu1 %vm202_vm2, %v3187_v58  ;;  %2822 = vmatmul.mubr.msk.bf16.gmra.mxu0 %vm202_vm2, %v3187_v58 }
 0x2a8   :  { %2827 = vmatprep.mubr.msk.bf16.mxu1 %vm76_vm1, %v3080_v5  ;;  %2845 = vmatprep.mubr.msk.bf16.mxu0 %vm76_vm1, %v3080_v5 }
 0x2af   :  { %2828 = vmatmul.mubr.msk.bf16.vlgmr.msra.gmra.mxu1 %vm76_vm1, %v3085_v6  ;;  %2846 = vmatmul.mubr.msk.bf16.vlgmr.msra.gmra.mxu0 %vm76_vm1, %v3085_v6 }
 0x2b0   :  { %2835 = vmatprep.mubr.msk.bf16.mxu1 %vm202_vm2, %v3134_v19  ;;  %2853 = vmatprep.mubr.msk.bf16.mxu0 %vm202_vm2, %v3134_v19 }
 0x35f   :  { %v2801_v39 = vpop.f32.mrf.mxu1  ;;  %v2819_v40 = vpop.f32.mrf.mxu0 }
 0x360   :  { %v818_v45 = vadd.f32 %v2801_v39, %v3209_v61  ;;  %v959_v47 = vadd.f32 %v2819_v40, %v3209_v61 }
 0x361   :  { %v809_v48 = vpop.f32.mrf.mxu1  ;;  %v950_v50 = vpop.f32.mrf.mxu0 }
 0x362   :  { %v810_v51 = vadd.f32 %v809_v48, %v3205_v59  ;;  %v951_v55 = vadd.f32 %v950_v50, %v3205_v59  ;;  %v842_v10 = vmax.f32 %v818_v45, 0.0  ;;  %v983_v11 = vmax.f32 %v959_v47, 0.0 }
 0x363   :  { %v2802_v63 = vpop.f32.mrf.mxu1  ;;  %v2820_v0 = vpop.f32.mrf.mxu0 }
 0x364   :  { %v821_v1 = vadd.f32 %v2802_v63, %v3211_v62  ;;  %v962_v9 = vadd.f32 %v2820_v0, %v3211_v62  ;;  %v840_v18 = vmax.f32 %v810_v51, 0.0  ;;  %v981_v23 = vmax.f32 %v951_v55, 0.0 }
 0x365   :  { %v812_v22 = vpop.f32.mrf.mxu1  ;;  %v953_v13 = vpop.f32.mrf.mxu0 }
 0x366   :  { %v843_v14 = vmax.f32 %v821_v1, 0.0  ;;  %v984_v32 = vmax.f32 %v962_v9, 0.0  ;;  %v813_v42 = vadd.f32 %v812_v22, %v3207_v60  ;;  %v954_v17 = vadd.f32 %v953_v13, %v3207_v60 }
 0x367   :  { %v2805_v24 = vpop.f32.mrf.mxu1  ;;  %v2823_v30 = vpop.f32.mrf.mxu0 }
 0x368   :  { %v849_v25 = vpack.c.bf16 %v843_v14, %v842_v10  ;;  %v3405_v27 = vpack.c.bf16 %v984_v32, %v983_v11  ;;  %v841_v29 = vmax.f32 %v813_v42, 0.0  ;;  %v982_v35 = vmax.f32 %v954_v17, 0.0 }
 0x369   :  { %v834_v43 = vadd.f32 %v2805_v24, %v3225_v31  ;;  %v825_v44 = vpop.f32.mrf.mxu1  ;;  %v966_v49 = vpop.f32.mrf.mxu0  ;;  %v975_v39 = vadd.f32 %v2823_v30, %v3225_v31 }
 0x36a   :  { %v3411_v36 = vmax.bf16 %v849_v25, %v712_v15  ;;  %v848_v37 = vpack.c.bf16 %v841_v29, %v840_v18  ;;  %v3413_v38 = vpack.c.bf16 %v982_v35, %v981_v23  ;;  %v826_v40 = vadd.f32 %v825_v44, %v3215_v7 }
 0x36b   :  { %v2806_v45 = vpop.f32.mrf.mxu1  ;;  %v2824_v47 = vpop.f32.mrf.mxu0  ;;  %v967_v53 = vadd.f32 %v966_v49, %v3215_v7  ;;  %v846_v15 = vmax.f32 %v834_v43, 0.0  ;;  %v987_v4 = vmax.f32 %v975_v39, 0.0 }
 0x36c   :  { %v994_v48 = vmax.bf16 %v3405_v27, %v3411_v36  ;;  %v3422_v50 = vmax.bf16 %v848_v37, %v711_v26  ;;  %v837_v2 = vadd.f32 %v2806_v45, %v3233_v41  ;;  %v978_v51 = vadd.f32 %v2824_v47, %v3233_v41 }
 0x36d   :  { %v828_v55 = vpop.f32.mrf.mxu1  ;;  %v969_v63 = vpop.f32.mrf.mxu0  ;;  %v844_v16 = vmax.f32 %v826_v40, 0.0  ;;  %v985_v13 = vmax.f32 %v967_v53, 0.0 }
 0x36e   :  { %v993_v0 = vmax.bf16 %v3413_v38, %v3422_v50  ;;  %v847_v1 = vmax.f32 %v837_v2, 0.0  ;;  %v829_v9 = vadd.f32 %v828_v55, %v3219_v12  ;;  %v970_v10 = vadd.f32 %v969_v63, %v3219_v12 }
 0x36f   :  { %v988_v26 = vmax.f32 %v978_v51, 0.0  ;;  %v2829_v11 = vpop.f32.mrf.mxu1  ;;  %v2847_v22 = vpop.f32.mrf.mxu0 }
 0x370   :  { %v851_v14 = vpack.c.bf16 %v847_v1, %v846_v15  ;;  %v845_v32 = vmax.f32 %v829_v9, 0.0  ;;  %v986_v42 = vmax.f32 %v970_v10, 0.0  ;;  %v1045_v18 = vadd.f32 %v2829_v11, %v3140_v20  ;;  %v2516_v11 = vld [vmem:[%s3935_s0 + $0x24] sm:$0x7] }
 0x371   :  { %v3431_v17 = vpack.c.bf16 %v988_v26, %v987_v4  ;;  %v1186_v23 = vadd.f32 %v2847_v22, %v3140_v20  ;;  %v1036_v24 = vpop.f32.mrf.mxu1  ;;  %v1177_v30 = vpop.f32.mrf.mxu0  ;;  %v2509_v26 = vld [vmem:[%s3935_s0 + $0x20] sm:$0x7] }
 0x372   :  { %v3438_v25 = vmax.bf16 %v851_v14, %v714_v3  ;;  %v850_v29 = vpack.c.bf16 %v845_v32, %v844_v16  ;;  %v3440_v35 = vpack.c.bf16 %v986_v42, %v985_v13  ;;  %v1037_v43 = vadd.f32 %v1036_v24, %v3142_v21 }
 0x373   :  { %v2830_v44 = vpop.f32.mrf.mxu1  ;;  %v2848_v49 = vpop.f32.mrf.mxu0  ;;  %v1053_v52 = vmax.f32 %v1045_v18, 0.0  ;;  %v1194_v3 = vmax.f32 %v1186_v23, 0.0  ;;  %v1178_v45 = vadd.f32 %v1177_v30, %v3142_v21  ;;  %v1282_v22 = vsel %vm83_vm0, %v2509_v26, 0 }
 0x374   :  { %v996_v37 = vmax.bf16 %v3431_v17, %v3438_v25  ;;  %v3448_v39 = vmax.bf16 %v850_v29, %v713_v34  ;;  %v1048_v40 = vadd.f32 %v2830_v44, %v3146_v28  ;;  %v1189_v46 = vadd.f32 %v2848_v49, %v3146_v28 }
 0x375   :  { %v1039_v47 = vpop.f32.mrf.mxu1  ;;  %v1180_v53 = vpop.f32.mrf.mxu0  ;;  %v1051_v8 = vmax.f32 %v1037_v43, 0.0  ;;  %v1192_v9 = vmax.f32 %v1178_v45, 0.0  ;;  %v1423_v13 = vsel %vm83_vm0, %v2516_v11, 0 }
 0x376   :  { %v995_v2 = vmax.bf16 %v3440_v35, %v3448_v39  ;;  %v1054_v15 = vmax.f32 %v1048_v40, 0.0  ;;  %v1195_v51 = vmax.f32 %v1189_v46, 0.0  ;;  %v1040_v55 = vadd.f32 %v1039_v47, %v3150_v33 }
 0x377   :  { %v1181_v56 = vadd.f32 %v1180_v53, %v3150_v33 }
 0x378   :  { %v1056_v34 = vpack.c.bf16 %v1054_v15, %v1053_v52  ;;  %v1197_v63 = vpack.c.bf16 %v1195_v51, %v1194_v3  ;;  %v1052_v1 = vmax.f32 %v1040_v55, 0.0 }
 0x379   :  { %v1193_v10 = vmax.f32 %v1181_v56, 0.0 }
 0x37a   :  { %v1055_v4 = vpack.c.bf16 %v1052_v1, %v1051_v8  ;;  %2831 = vmatprep.subr.bf16.mxu1 %v1056_v34  ;;  %2849 = vmatprep.subr.bf16.mxu0 %v1197_v63 }
 0x37b   :  { %v1196_v16 = vpack.c.bf16 %v1193_v10, %v1192_v9  ;;  %2832 = vmatpush3.bf16.msra.mxu1 %v1056_v34  ;;  %2850 = vmatpush3.bf16.msra.mxu0 %v1197_v63 }
 0x37c   :  { %2833 = vmatprep.subr.bf16.mxu1 %v1055_v4 }
 0x37d   :  { %2851 = vmatprep.subr.bf16.mxu0 %v1196_v16 }
 0x37f   :  { %2834 = vmatpush3.bf16.msra.mxu1 %v1055_v4  ;;  %2852 = vmatpush3.bf16.msra.mxu0 %v1196_v16 }
 0x380   :  { %3013 = vmatprep.subr.msk.bf16.mxu1 %vm83_vm0, %v2509_v26  ;;  %3014 = vmatprep.subr.msk.bf16.mxu0 %vm83_vm0, %v2516_v11 }
 0x382   :  { %2836 = vmatmul.mubr.msk.bf16.vlgmr.msra.gmra.mxu1 %vm202_vm2, %v3165_v54  ;;  %2854 = vmatmul.mubr.msk.bf16.vlgmr.msra.gmra.mxu0 %vm202_vm2, %v3165_v54 }
 0x383   :  { %2862 = vmatpush3.bf16.msra.mxu1 %v1282_v22  ;;  %2880 = vmatpush3.bf16.msra.mxu0 %v1423_v13 }
 0x384   :  { %2839 = vmatprep.mubr.msk.bf16.mxu1 %vm202_vm2, %v3174_v57  ;;  %2857 = vmatprep.mubr.msk.bf16.mxu0 %vm202_vm2, %v3174_v57 }
 0x38a   :  { %2840 = vmatmul.mubr.msk.bf16.gmra.mxu1 %vm202_vm2, %v3187_v58  ;;  %2858 = vmatmul.mubr.msk.bf16.gmra.mxu0 %vm202_vm2, %v3187_v58 }
 0x38b   :  { %2863 = vmatprep.mubr.msk.bf16.mxu1 %vm76_vm1, %v3080_v5  ;;  %2881 = vmatprep.mubr.msk.bf16.mxu0 %vm76_vm1, %v3080_v5 }
 0x392   :  { %2864 = vmatmul.mubr.msk.bf16.vlgmr.msra.gmra.mxu1 %vm76_vm1, %v3085_v6  ;;  %2882 = vmatmul.mubr.msk.bf16.vlgmr.msra.gmra.mxu0 %vm76_vm1, %v3085_v6 }
 0x393   :  { %2871 = vmatprep.mubr.msk.bf16.mxu1 %vm202_vm2, %v3134_v19  ;;  %2889 = vmatprep.mubr.msk.bf16.mxu0 %vm202_vm2, %v3134_v19 }
 0x442   :  { %v2837_v14 = vpop.f32.mrf.mxu1  ;;  %v2855_v32 = vpop.f32.mrf.mxu0 }
 0x443   :  { %v1100_v42 = vadd.f32 %v2837_v14, %v3209_v61  ;;  %v1241_v18 = vadd.f32 %v2855_v32, %v3209_v61 }
 0x444   :  { %v1091_v23 = vpop.f32.mrf.mxu1  ;;  %v1232_v5 = vpop.f32.mrf.mxu0 }
 0x445   :  { %v1092_v24 = vadd.f32 %v1091_v23, %v3205_v59  ;;  %v1233_v30 = vadd.f32 %v1232_v5, %v3205_v59  ;;  %v1124_v49 = vmax.f32 %v1100_v42, 0.0  ;;  %v1265_v19 = vmax.f32 %v1241_v18, 0.0 }
 0x446   :  { %v2838_v29 = vpop.f32.mrf.mxu1  ;;  %v2856_v6 = vpop.f32.mrf.mxu0 }
 0x447   :  { %v1103_v43 = vadd.f32 %v2838_v29, %v3211_v62  ;;  %v1244_v44 = vadd.f32 %v2856_v6, %v3211_v62  ;;  %v1122_v53 = vmax.f32 %v1092_v24, 0.0  ;;  %v1263_v15 = vmax.f32 %v1233_v30, 0.0 }
 0x448   :  { %v1094_v40 = vpop.f32.mrf.mxu1  ;;  %v1235_v46 = vpop.f32.mrf.mxu0 }
 0x449   :  { %v1125_v52 = vmax.f32 %v1103_v43, 0.0  ;;  %v1266_v3 = vmax.f32 %v1244_v44, 0.0  ;;  %v1095_v45 = vadd.f32 %v1094_v40, %v3207_v60  ;;  %v1236_v47 = vadd.f32 %v1235_v46, %v3207_v60 }
 0x44a   :  { %v2841_v51 = vpop.f32.mrf.mxu1  ;;  %v2859_v55 = vpop.f32.mrf.mxu0 }
 0x44b   :  { %v1131_v56 = vpack.c.bf16 %v1125_v52, %v1124_v49  ;;  %v3499_v8 = vpack.c.bf16 %v1266_v3, %v1265_v19  ;;  %v1123_v34 = vmax.f32 %v1095_v45, 0.0  ;;  %v1264_v63 = vmax.f32 %v1236_v47, 0.0 }
 0x44c   :  { %v1116_v1 = vadd.f32 %v2841_v51, %v3225_v31  ;;  %v1107_v9 = vpop.f32.mrf.mxu1  ;;  %v1248_v10 = vpop.f32.mrf.mxu0  ;;  %v1257_v11 = vadd.f32 %v2859_v55, %v3225_v31 }
 0x44d   :  { %v3505_v4 = vmax.bf16 %v1131_v56, %v994_v48  ;;  %v1130_v16 = vpack.c.bf16 %v1123_v34, %v1122_v53  ;;  %v3507_v26 = vpack.c.bf16 %v1264_v63, %v1263_v15  ;;  %v1108_v22 = vadd.f32 %v1107_v9, %v3215_v7 }
 0x44e   :  { %v2842_v13 = vpop.f32.mrf.mxu1  ;;  %v2860_v14 = vpop.f32.mrf.mxu0  ;;  %v1249_v27 = vadd.f32 %v1248_v10, %v3215_v7  ;;  %v1128_v48 = vmax.f32 %v1116_v1, 0.0  ;;  %v1269_v38 = vmax.f32 %v1257_v11, 0.0 }
 0x44f   :  { %v1276_v32 = vmax.bf16 %v3499_v8, %v3505_v4  ;;  %v3516_v42 = vmax.bf16 %v1130_v16, %v993_v0  ;;  %v1119_v36 = vadd.f32 %v2842_v13, %v3233_v41  ;;  %v1260_v18 = vadd.f32 %v2860_v14, %v3233_v41 }
 0x450   :  { %v1110_v23 = vpop.f32.mrf.mxu1  ;;  %v1251_v5 = vpop.f32.mrf.mxu0  ;;  %v1126_v50 = vmax.f32 %v1108_v22, 0.0  ;;  %v1267_v49 = vmax.f32 %v1249_v27, 0.0 }
 0x451   :  { %v1275_v24 = vmax.bf16 %v3507_v26, %v3516_v42  ;;  %v1129_v30 = vmax.f32 %v1119_v36, 0.0  ;;  %v1111_v29 = vadd.f32 %v1110_v23, %v3219_v12  ;;  %v1252_v6 = vadd.f32 %v1251_v5, %v3219_v12 }
 0x452   :  { %v1270_v0 = vmax.f32 %v1260_v18, 0.0  ;;  %v2865_v43 = vpop.f32.mrf.mxu1  ;;  %v2883_v44 = vpop.f32.mrf.mxu0 }
 0x453   :  { %v1133_v19 = vpack.c.bf16 %v1129_v30, %v1128_v48  ;;  %v1127_v40 = vmax.f32 %v1111_v29, 0.0  ;;  %v1268_v46 = vmax.f32 %v1252_v6, 0.0  ;;  %v1327_v3 = vadd.f32 %v2865_v43, %v3140_v20  ;;  %v2523_v6 = vld [vmem:[%s3935_s0 + $0x28] sm:$0x7]  ;;  %v3576_v43 = vld [vmem:[%s3936_s1] sm:$0xff]  }
 0x454   :  { %v3525_v52 = vpack.c.bf16 %v1270_v0, %v1269_v38  ;;  %v1468_v45 = vadd.f32 %v2883_v44, %v3140_v20  ;;  %v1318_v47 = vpop.f32.mrf.mxu1  ;;  %v1459_v53 = vpop.f32.mrf.mxu0  ;;  %v2530_v38 = vld [vmem:[%s3935_s0 + $0x2c] sm:$0x7] }
 0x455   :  { %v3532_v15 = vmax.bf16 %v1133_v19, %v996_v37  ;;  %v1132_v51 = vpack.c.bf16 %v1127_v40, %v1126_v50  ;;  %v3534_v55 = vpack.c.bf16 %v1268_v46, %v1267_v49  ;;  %v1319_v56 = vadd.f32 %v1318_v47, %v3142_v21 }
 0x456   :  { %v2866_v34 = vpop.f32.mrf.mxu1  ;;  %v2884_v63 = vpop.f32.mrf.mxu0  ;;  %v1335_v25 = vmax.f32 %v1327_v3, 0.0  ;;  %v1476_v37 = vmax.f32 %v1468_v45, 0.0  ;;  %v1460_v16 = vadd.f32 %v1459_v53, %v3142_v21  ;;  %v1564_v50 = vsel %vm83_vm0, %v2523_v6, 0 }
 0x457   :  { %v1278_v1 = vmax.bf16 %v3525_v52, %v3532_v15  ;;  %v3542_v9 = vmax.bf16 %v1132_v51, %v995_v2  ;;  %v1330_v10 = vadd.f32 %v2866_v34, %v3146_v28  ;;  %v1471_v17 = vadd.f32 %v2884_v63, %v3146_v28 }
 0x458   :  { %v1321_v11 = vpop.f32.mrf.mxu1  ;;  %v1462_v22 = vpop.f32.mrf.mxu0  ;;  %v1333_v39 = vmax.f32 %v1319_v56, 0.0  ;;  %v1474_v23 = vmax.f32 %v1460_v16, 0.0  ;;  %v1705_v0 = vsel %vm83_vm0, %v2530_v38, 0 }
 0x459   :  { %v1277_v13 = vmax.bf16 %v3534_v55, %v3542_v9  ;;  %v1336_v14 = vmax.f32 %v1330_v10, 0.0  ;;  %v1477_v27 = vmax.f32 %v1471_v17, 0.0  ;;  %v1322_v36 = vadd.f32 %v1321_v11, %v3150_v33 }
 0x45a   :  { %v1463_v35 = vadd.f32 %v1462_v22, %v3150_v33 }
 0x45b   :  { %v1338_v2 = vpack.c.bf16 %v1336_v14, %v1335_v25  ;;  %v1479_v48 = vpack.c.bf16 %v1477_v27, %v1476_v37  ;;  %v1334_v18 = vmax.f32 %v1322_v36, 0.0 }
 0x45c   :  { %v1475_v5 = vmax.f32 %v1463_v35, 0.0 }
 0x45d   :  { %v1337_v30 = vpack.c.bf16 %v1334_v18, %v1333_v39  ;;  %2867 = vmatprep.subr.bf16.mxu1 %v1338_v2  ;;  %2885 = vmatprep.subr.bf16.mxu0 %v1479_v48 }
 0x45e   :  { %v1478_v29 = vpack.c.bf16 %v1475_v5, %v1474_v23  ;;  %2868 = vmatpush3.bf16.msra.mxu1 %v1338_v2  ;;  %2886 = vmatpush3.bf16.msra.mxu0 %v1479_v48 }
 0x45f   :  { %2869 = vmatprep.subr.bf16.mxu1 %v1337_v30 }
 0x460   :  { %2887 = vmatprep.subr.bf16.mxu0 %v1478_v29 }
 0x462   :  { %2870 = vmatpush3.bf16.msra.mxu1 %v1337_v30  ;;  %2888 = vmatpush3.bf16.msra.mxu0 %v1478_v29 }
 0x463   :  { %3015 = vmatprep.subr.msk.bf16.mxu1 %vm83_vm0, %v2523_v6  ;;  %3016 = vmatprep.subr.msk.bf16.mxu0 %vm83_vm0, %v2530_v38 }
 0x465   :  { %2872 = vmatmul.mubr.msk.bf16.vlgmr.msra.gmra.mxu1 %vm202_vm2, %v3165_v54  ;;  %2890 = vmatmul.mubr.msk.bf16.vlgmr.msra.gmra.mxu0 %vm202_vm2, %v3165_v54  ;;  %v3585_v54 = vld [vmem:[%s3936_s1 + $0x8] sm:$0xff]  }
 0x466   :  { %2898 = vmatpush3.bf16.msra.mxu1 %v1564_v50  ;;  %2916 = vmatpush3.bf16.msra.mxu0 %v1705_v0 }
 0x467   :  { %2875 = vmatprep.mubr.msk.bf16.mxu1 %vm202_vm2, %v3174_v57  ;;  %2893 = vmatprep.mubr.msk.bf16.mxu0 %vm202_vm2, %v3174_v57  ;;  %v3594_v57 = vld [vmem:[%s3939_s3] sm:$0xff]  }
 0x46d   :  { %2876 = vmatmul.mubr.msk.bf16.gmra.mxu1 %vm202_vm2, %v3187_v58  ;;  %2894 = vmatmul.mubr.msk.bf16.gmra.mxu0 %vm202_vm2, %v3187_v58 }
 0x46e   :  { %2899 = vmatprep.mubr.msk.bf16.mxu1 %vm76_vm1, %v3576_v43  ;;  %2917 = vmatprep.mubr.msk.bf16.mxu0 %vm76_vm1, %v3576_v43 }
 0x475   :  { %2900 = vmatmul.mubr.msk.bf16.vlgmr.msra.gmra.mxu1 %vm76_vm1, %v3585_v54  ;;  %2918 = vmatmul.mubr.msk.bf16.vlgmr.msra.gmra.mxu0 %vm76_vm1, %v3585_v54 }
 0x476   :  { %2907 = vmatprep.mubr.msk.bf16.mxu1 %vm202_vm2, %v3594_v57  ;;  %2925 = vmatprep.mubr.msk.bf16.mxu0 %vm202_vm2, %v3594_v57 }
 0x525   :  { %v2873_v58 = vpop.f32.mrf.mxu1  ;;  %v2891_v44 = vpop.f32.mrf.mxu0 }
 0x526   :  { %v1382_v49 = vadd.f32 %v2873_v58, %v3209_v61  ;;  %v1523_v19 = vadd.f32 %v2891_v44, %v3209_v61 }
 0x527   :  { %v1373_v40 = vpop.f32.mrf.mxu1  ;;  %v1514_v46 = vpop.f32.mrf.mxu0 }
 0x528   :  { %v1374_v3 = vadd.f32 %v1373_v40, %v3205_v59  ;;  %v1515_v45 = vadd.f32 %v1514_v46, %v3205_v59  ;;  %v1406_v34 = vmax.f32 %v1382_v49, 0.0  ;;  %v1547_v63 = vmax.f32 %v1523_v19, 0.0 }
 0x529   :  { %v2874_v47 = vpop.f32.mrf.mxu1  ;;  %v2892_v53 = vpop.f32.mrf.mxu0 }
 0x52a   :  { %v1385_v51 = vadd.f32 %v2874_v47, %v3211_v62  ;;  %v1526_v56 = vadd.f32 %v2892_v53, %v3211_v62  ;;  %v1404_v22 = vmax.f32 %v1374_v3, 0.0  ;;  %v1545_v14 = vmax.f32 %v1515_v45, 0.0 }
 0x52b   :  { %v1376_v10 = vpop.f32.mrf.mxu1  ;;  %v1517_v17 = vpop.f32.mrf.mxu0 }
 0x52c   :  { %v1407_v25 = vmax.f32 %v1385_v51, 0.0  ;;  %v1548_v37 = vmax.f32 %v1526_v56, 0.0  ;;  %v1377_v16 = vadd.f32 %v1376_v10, %v3207_v60  ;;  %v1518_v11 = vadd.f32 %v1517_v17, %v3207_v60 }
 0x52d   :  { %v2877_v27 = vpop.f32.mrf.mxu1  ;;  %v2895_v36 = vpop.f32.mrf.mxu0 }
 0x52e   :  { %v1413_v35 = vpack.c.bf16 %v1407_v25, %v1406_v34  ;;  %v3608_v39 = vpack.c.bf16 %v1548_v37, %v1547_v63  ;;  %v1405_v2 = vmax.f32 %v1377_v16, 0.0  ;;  %v1546_v48 = vmax.f32 %v1518_v11, 0.0 }
 0x52f   :  { %v1398_v18 = vadd.f32 %v2877_v27, %v3225_v31  ;;  %v1389_v23 = vpop.f32.mrf.mxu1  ;;  %v1530_v5 = vpop.f32.mrf.mxu0  ;;  %v1539_v38 = vadd.f32 %v2895_v36, %v3225_v31 }
 0x530   :  { %v3614_v30 = vmax.bf16 %v1413_v35, %v1276_v32  ;;  %v1412_v29 = vpack.c.bf16 %v1405_v2, %v1404_v22  ;;  %v3616_v6 = vpack.c.bf16 %v1546_v48, %v1545_v14  ;;  %v1390_v50 = vadd.f32 %v1389_v23, %v3215_v7 }
 0x531   :  { %v2878_v0 = vpop.f32.mrf.mxu1  ;;  %v2896_v58 = vpop.f32.mrf.mxu0  ;;  %v1531_v8 = vadd.f32 %v1530_v5, %v3215_v7  ;;  %v1410_v32 = vmax.f32 %v1398_v18, 0.0  ;;  %v1551_v26 = vmax.f32 %v1539_v38, 0.0 }
 0x532   :  { %v1558_v44 = vmax.bf16 %v3608_v39, %v3614_v30  ;;  %v3625_v49 = vmax.bf16 %v1412_v29, %v1275_v24  ;;  %v1401_v4 = vadd.f32 %v2878_v0, %v3233_v41  ;;  %v1542_v19 = vadd.f32 %v2896_v58, %v3233_v41 }
 0x533   :  { %v1392_v40 = vpop.f32.mrf.mxu1  ;;  %v1533_v46 = vpop.f32.mrf.mxu0  ;;  %v1408_v42 = vmax.f32 %v1390_v50, 0.0  ;;  %v1549_v34 = vmax.f32 %v1531_v8, 0.0 }
 0x534   :  { %v1557_v3 = vmax.bf16 %v3616_v6, %v3625_v49  ;;  %v1411_v45 = vmax.f32 %v1401_v4, 0.0  ;;  %v1393_v47 = vadd.f32 %v1392_v40, %v3219_v12  ;;  %v1534_v53 = vadd.f32 %v1533_v46, %v3219_v12 }
 0x535   :  { %v1552_v24 = vmax.f32 %v1542_v19, 0.0  ;;  %v2901_v51 = vpop.f32.mrf.mxu1  ;;  %v2919_v56 = vpop.f32.mrf.mxu0 }
 0x536   :  { %v1415_v63 = vpack.c.bf16 %v1411_v45, %v1410_v32  ;;  %v1409_v10 = vmax.f32 %v1393_v47, 0.0  ;;  %v1550_v17 = vmax.f32 %v1534_v53, 0.0  ;;  %v1609_v37 = vadd.f32 %v2901_v51, %v3140_v20  ;;  %v2537_v53 = vld [vmem:[%s3935_s0 + $0x30] sm:$0x7]  ;;  %v3673_v51 = vld [vmem:[%s3939_s3 + $0x8] sm:$0xff]  }
 0x537   :  { %v3634_v25 = vpack.c.bf16 %v1552_v24, %v1551_v26  ;;  %v1750_v16 = vadd.f32 %v2919_v56, %v3140_v20  ;;  %v1600_v11 = vpop.f32.mrf.mxu1  ;;  %v1741_v22 = vpop.f32.mrf.mxu0  ;;  %v2544_v26 = vld [vmem:[%s3935_s0 + $0x34] sm:$0x7] }
 0x538   :  { %v3641_v14 = vmax.bf16 %v1415_v63, %v1278_v1  ;;  %v1414_v27 = vpack.c.bf16 %v1409_v10, %v1408_v42  ;;  %v3643_v36 = vpack.c.bf16 %v1550_v17, %v1549_v34  ;;  %v1601_v35 = vadd.f32 %v1600_v11, %v3142_v21  ;;  %v3682_v56 = vld [vmem:[%s3939_s3 + $0x10] sm:$0xff]   ;;  %v3691_v34 = vld [vmem:[%s3939_s3 + $0x18] sm:$0xff]  }
 0x539   :  { %v2902_v2 = vpop.f32.mrf.mxu1  ;;  %v2920_v48 = vpop.f32.mrf.mxu0  ;;  %v1617_v15 = vmax.f32 %v1609_v37, 0.0  ;;  %v1758_v1 = vmax.f32 %v1750_v16, 0.0  ;;  %v1742_v29 = vadd.f32 %v1741_v22, %v3142_v21  ;;  %v1846_v42 = vsel %vm83_vm0, %v2537_v53, 0 }
 0x53a   :  { %v1560_v18 = vmax.bf16 %v3634_v25, %v3641_v14  ;;  %v3651_v23 = vmax.bf16 %v1414_v27, %v1277_v13  ;;  %v1612_v5 = vadd.f32 %v2902_v2, %v3146_v28  ;;  %v1753_v52 = vadd.f32 %v2920_v48, %v3146_v28 }
 0x53b   :  { %v1603_v38 = vpop.f32.mrf.mxu1  ;;  %v1744_v50 = vpop.f32.mrf.mxu0  ;;  %v1615_v9 = vmax.f32 %v1601_v35, 0.0  ;;  %v1756_v40 = vmax.f32 %v1742_v29, 0.0  ;;  %v1987_v24 = vsel %vm83_vm0, %v2544_v26, 0 }
 0x53c   :  { %v1559_v0 = vmax.bf16 %v3643_v36, %v3651_v23  ;;  %v1618_v58 = vmax.f32 %v1612_v5, 0.0  ;;  %v1759_v8 = vmax.f32 %v1753_v52, 0.0  ;;  %v1604_v4 = vadd.f32 %v1603_v38, %v3150_v33 }
 0x53d   :  { %v1745_v55 = vadd.f32 %v1744_v50, %v3150_v33 }
 0x53e   :  { %v1620_v13 = vpack.c.bf16 %v1618_v58, %v1617_v15  ;;  %v1761_v32 = vpack.c.bf16 %v1759_v8, %v1758_v1  ;;  %v1616_v19 = vmax.f32 %v1604_v4, 0.0 }
 0x53f   :  { %v1757_v46 = vmax.f32 %v1745_v55, 0.0 }
 0x540   :  { %v1619_v45 = vpack.c.bf16 %v1616_v19, %v1615_v9  ;;  %2903 = vmatprep.subr.bf16.mxu1 %v1620_v13  ;;  %2921 = vmatprep.subr.bf16.mxu0 %v1761_v32 }
 0x541   :  { %v1760_v47 = vpack.c.bf16 %v1757_v46, %v1756_v40  ;;  %2904 = vmatpush3.bf16.msra.mxu1 %v1620_v13  ;;  %2922 = vmatpush3.bf16.msra.mxu0 %v1761_v32 }
 0x542   :  { %2905 = vmatprep.subr.bf16.mxu1 %v1619_v45 }
 0x543   :  { %2923 = vmatprep.subr.bf16.mxu0 %v1760_v47 }
 0x545   :  { %2906 = vmatpush3.bf16.msra.mxu1 %v1619_v45  ;;  %2924 = vmatpush3.bf16.msra.mxu0 %v1760_v47 }
 0x546   :  { %3017 = vmatprep.subr.msk.bf16.mxu1 %vm83_vm0, %v2537_v53  ;;  %3018 = vmatprep.subr.msk.bf16.mxu0 %vm83_vm0, %v2544_v26 }
 0x548   :  { %2908 = vmatmul.mubr.msk.bf16.vlgmr.msra.gmra.mxu1 %vm202_vm2, %v3673_v51  ;;  %2926 = vmatmul.mubr.msk.bf16.vlgmr.msra.gmra.mxu0 %vm202_vm2, %v3673_v51 }
 0x549   :  { %2934 = vmatpush3.bf16.msra.mxu1 %v1846_v42  ;;  %2952 = vmatpush3.bf16.msra.mxu0 %v1987_v24 }
 0x54a   :  { %2911 = vmatprep.mubr.msk.bf16.mxu1 %vm202_vm2, %v3682_v56  ;;  %2929 = vmatprep.mubr.msk.bf16.mxu0 %vm202_vm2, %v3682_v56 }
 0x550   :  { %2912 = vmatmul.mubr.msk.bf16.gmra.mxu1 %vm202_vm2, %v3691_v34  ;;  %2930 = vmatmul.mubr.msk.bf16.gmra.mxu0 %vm202_vm2, %v3691_v34 }
 0x551   :  { %2935 = vmatprep.mubr.msk.bf16.mxu1 %vm76_vm1, %v3576_v43  ;;  %2953 = vmatprep.mubr.msk.bf16.mxu0 %vm76_vm1, %v3576_v43 }
 0x558   :  { %2936 = vmatmul.mubr.msk.bf16.vlgmr.msra.gmra.mxu1 %vm76_vm1, %v3585_v54  ;;  %2954 = vmatmul.mubr.msk.bf16.vlgmr.msra.gmra.mxu0 %vm76_vm1, %v3585_v54 }
 0x559   :  { %2943 = vmatprep.mubr.msk.bf16.mxu1 %vm202_vm2, %v3594_v57  ;;  %2961 = vmatprep.mubr.msk.bf16.mxu0 %vm202_vm2, %v3594_v57 }
 0x608   :  { %v2909_v63 = vpop.f32.mrf.mxu1  ;;  %v2927_v10 = vpop.f32.mrf.mxu0 }
 0x609   :  { %v1664_v17 = vadd.f32 %v2909_v63, %v3209_v61  ;;  %v1805_v37 = vadd.f32 %v2927_v10, %v3209_v61 }
 0x60a   :  { %v1655_v16 = vpop.f32.mrf.mxu1  ;;  %v1796_v11 = vpop.f32.mrf.mxu0 }
 0x60b   :  { %v1656_v22 = vadd.f32 %v1655_v16, %v3205_v59  ;;  %v1797_v27 = vadd.f32 %v1796_v11, %v3205_v59  ;;  %v1688_v52 = vmax.f32 %v1664_v17, 0.0  ;;  %v1829_v15 = vmax.f32 %v1805_v37, 0.0 }
 0x60c   :  { %v2910_v35 = vpop.f32.mrf.mxu1  ;;  %v2928_v2 = vpop.f32.mrf.mxu0 }
 0x60d   :  { %v1667_v48 = vadd.f32 %v2910_v35, %v3211_v62  ;;  %v1808_v5 = vadd.f32 %v2928_v2, %v3211_v62  ;;  %v1686_v4 = vmax.f32 %v1656_v22, 0.0  ;;  %v1827_v55 = vmax.f32 %v1797_v27, 0.0 }
 0x60e   :  { %v1658_v1 = vpop.f32.mrf.mxu1  ;;  %v1799_v29 = vpop.f32.mrf.mxu0 }
 0x60f   :  { %v1689_v38 = vmax.f32 %v1667_v48, 0.0  ;;  %v1830_v50 = vmax.f32 %v1808_v5, 0.0  ;;  %v1659_v58 = vadd.f32 %v1658_v1, %v3207_v60  ;;  %v1800_v8 = vadd.f32 %v1799_v29, %v3207_v60 }
 0x610   :  { %v2913_v9 = vpop.f32.mrf.mxu1  ;;  %v2931_v13 = vpop.f32.mrf.mxu0 }
 0x611   :  { %v1695_v32 = vpack.c.bf16 %v1689_v38, %v1688_v52  ;;  %v3717_v19 = vpack.c.bf16 %v1830_v50, %v1829_v15  ;;  %v1687_v40 = vmax.f32 %v1659_v58, 0.0  ;;  %v1828_v46 = vmax.f32 %v1800_v8, 0.0 }
 0x612   :  { %v1680_v45 = vadd.f32 %v2913_v9, %v3225_v31  ;;  %v1671_v47 = vpop.f32.mrf.mxu1  ;;  %v1812_v53 = vpop.f32.mrf.mxu0  ;;  %v1821_v63 = vadd.f32 %v2931_v13, %v3225_v31 }
 0x613   :  { %v3723_v26 = vmax.bf16 %v1695_v32, %v1558_v44  ;;  %v1694_v42 = vpack.c.bf16 %v1687_v40, %v1686_v4  ;;  %v3725_v24 = vpack.c.bf16 %v1828_v46, %v1827_v55  ;;  %v1672_v10 = vadd.f32 %v1671_v47, %v3215_v7 }
 0x614   :  { %v2914_v17 = vpop.f32.mrf.mxu1  ;;  %v2932_v37 = vpop.f32.mrf.mxu0  ;;  %v1813_v39 = vadd.f32 %v1812_v53, %v3215_v7  ;;  %v1692_v44 = vmax.f32 %v1680_v45, 0.0  ;;  %v1833_v6 = vmax.f32 %v1821_v63, 0.0 }
 0x615   :  { %v1840_v16 = vmax.bf16 %v3717_v19, %v3723_v26  ;;  %v3734_v11 = vmax.bf16 %v1694_v42, %v1557_v3  ;;  %v1683_v30 = vadd.f32 %v2914_v17, %v3233_v41  ;;  %v1824_v22 = vadd.f32 %v2932_v37, %v3233_v41 }
 0x616   :  { %v1674_v27 = vpop.f32.mrf.mxu1  ;;  %v1815_v35 = vpop.f32.mrf.mxu0  ;;  %v1690_v49 = vmax.f32 %v1672_v10, 0.0  ;;  %v1831_v29 = vmax.f32 %v1813_v39, 0.0 }
 0x617   :  { %v1839_v2 = vmax.bf16 %v3725_v24, %v3734_v11  ;;  %v1693_v48 = vmax.f32 %v1683_v30, 0.0  ;;  %v1675_v5 = vadd.f32 %v1674_v27, %v3219_v12  ;;  %v1816_v52 = vadd.f32 %v1815_v35, %v3219_v12 }
 0x618   :  { %v1834_v3 = vmax.f32 %v1824_v22, 0.0  ;;  %v2937_v15 = vpop.f32.mrf.mxu1  ;;  %v2955_v1 = vpop.f32.mrf.mxu0 }
 0x619   :  { %v1697_v38 = vpack.c.bf16 %v1693_v48, %v1692_v44  ;;  %v1691_v50 = vmax.f32 %v1675_v5, 0.0  ;;  %v1832_v58 = vmax.f32 %v1816_v52, 0.0  ;;  %v1891_v4 = vadd.f32 %v2937_v15, %v3140_v20  ;;  %v2558_v15 = vld [vmem:[%s3935_s0 + $0x3c] sm:$0x7] }
 0x61a   :  { %v3743_v8 = vpack.c.bf16 %v1834_v3, %v1833_v6  ;;  %v2032_v55 = vadd.f32 %v2955_v1, %v3140_v20  ;;  %v1882_v9 = vpop.f32.mrf.mxu1  ;;  %v2023_v13 = vpop.f32.mrf.mxu0  ;;  %v2551_v3 = vld [vmem:[%s3935_s0 + $0x38] sm:$0x7] }
 0x61b   :  { %v3750_v32 = vmax.bf16 %v1697_v38, %v1560_v18  ;;  %v1696_v40 = vpack.c.bf16 %v1691_v50, %v1690_v49  ;;  %v3752_v46 = vpack.c.bf16 %v1832_v58, %v1831_v29  ;;  %v1883_v45 = vadd.f32 %v1882_v9, %v3142_v21 }
 0x61c   :  { %v2938_v47 = vpop.f32.mrf.mxu1  ;;  %v2956_v53 = vpop.f32.mrf.mxu0  ;;  %v1899_v14 = vmax.f32 %v1891_v4, 0.0  ;;  %v2040_v18 = vmax.f32 %v2032_v55, 0.0  ;;  %v2024_v17 = vadd.f32 %v2023_v13, %v3142_v21  ;;  %v2128_v1 = vsel %vm83_vm0, %v2551_v3, 0 }
 0x61d   :  { %v1842_v42 = vmax.bf16 %v3743_v8, %v3750_v32  ;;  %v3760_v63 = vmax.bf16 %v1696_v40, %v1559_v0  ;;  %v1894_v10 = vadd.f32 %v2938_v47, %v3146_v28  ;;  %v2035_v25 = vadd.f32 %v2956_v53, %v3146_v28 }
 0x61e   :  { %v1885_v37 = vpop.f32.mrf.mxu1  ;;  %v2026_v39 = vpop.f32.mrf.mxu0  ;;  %v1897_v23 = vmax.f32 %v1883_v45, 0.0  ;;  %v2038_v5 = vmax.f32 %v2024_v17, 0.0  ;;  %v2269_v29 = vsel %vm83_vm0, %v2558_v15, 0 }
 0x61f   :  { %v1841_v30 = vmax.bf16 %v3752_v46, %v3760_v63  ;;  %v1900_v44 = vmax.f32 %v1894_v10, 0.0  ;;  %v2041_v22 = vmax.f32 %v2035_v25, 0.0  ;;  %v1886_v27 = vadd.f32 %v1885_v37, %v3150_v33 }
 0x620   :  { %v2027_v36 = vadd.f32 %v2026_v39, %v3150_v33 }
 0x621   :  { %v1902_v0 = vpack.c.bf16 %v1900_v44, %v1899_v14  ;;  %v2043_v35 = vpack.c.bf16 %v2041_v22, %v2040_v18  ;;  %v1898_v48 = vmax.f32 %v1886_v27, 0.0 }
 0x622   :  { %v2039_v52 = vmax.f32 %v2027_v36, 0.0 }
 0x623   :  { %v1901_v6 = vpack.c.bf16 %v1898_v48, %v1897_v23  ;;  %2939 = vmatprep.subr.bf16.mxu1 %v1902_v0  ;;  %2957 = vmatprep.subr.bf16.mxu0 %v2043_v35 }
 0x624   :  { %v2042_v49 = vpack.c.bf16 %v2039_v52, %v2038_v5  ;;  %2940 = vmatpush3.bf16.msra.mxu1 %v1902_v0  ;;  %2958 = vmatpush3.bf16.msra.mxu0 %v2043_v35 }
 0x625   :  { %2941 = vmatprep.subr.bf16.mxu1 %v1901_v6 }
 0x626   :  { %2959 = vmatprep.subr.bf16.mxu0 %v2042_v49 }
 0x628   :  { %2942 = vmatpush3.bf16.msra.mxu1 %v1901_v6  ;;  %2960 = vmatpush3.bf16.msra.mxu0 %v2042_v49 }
 0x629   :  { %3019 = vmatprep.subr.msk.bf16.mxu1 %vm83_vm0, %v2551_v3  ;;  %3020 = vmatprep.subr.msk.bf16.mxu0 %vm83_vm0, %v2558_v15 }
 0x62b   :  { %2944 = vmatmul.mubr.msk.bf16.vlgmr.msra.gmra.mxu1 %vm202_vm2, %v3673_v51  ;;  %2962 = vmatmul.mubr.msk.bf16.vlgmr.msra.gmra.mxu0 %vm202_vm2, %v3673_v51 }
 0x62c   :  { %2970 = vmatpush3.bf16.msra.mxu1 %v2128_v1  ;;  %2988 = vmatpush3.bf16.msra.mxu0 %v2269_v29 }
 0x62d   :  { %2947 = vmatprep.mubr.msk.bf16.mxu1 %vm202_vm2, %v3682_v56  ;;  %2965 = vmatprep.mubr.msk.bf16.mxu0 %vm202_vm2, %v3682_v56 }
 0x633   :  { %2948 = vmatmul.mubr.msk.bf16.gmra.mxu1 %vm202_vm2, %v3691_v34  ;;  %2966 = vmatmul.mubr.msk.bf16.gmra.mxu0 %vm202_vm2, %v3691_v34 }
 0x634   :  { %2971 = vmatprep.mubr.msk.bf16.mxu1 %vm76_vm1, %v3576_v43  ;;  %2989 = vmatprep.mubr.msk.bf16.mxu0 %vm76_vm1, %v3576_v43 }
 0x63b   :  { %2972 = vmatmul.mubr.msk.bf16.vlgmr.msra.gmra.mxu1 %vm76_vm1, %v3585_v54  ;;  %2990 = vmatmul.mubr.msk.bf16.vlgmr.msra.gmra.mxu0 %vm76_vm1, %v3585_v54 }
 0x63c   :  { %2979 = vmatprep.mubr.msk.bf16.mxu1 %vm202_vm2, %v3594_v57  ;;  %2997 = vmatprep.mubr.msk.bf16.mxu0 %vm202_vm2, %v3594_v57 }
 0x6eb   :  { %v2945_v38 = vpop.f32.mrf.mxu1  ;;  %v2963_v50 = vpop.f32.mrf.mxu0 }
 0x6ec   :  { %v1946_v58 = vadd.f32 %v2945_v38, %v3209_v61  ;;  %v2087_v4 = vadd.f32 %v2963_v50, %v3209_v61 }
 0x6ed   :  { %v1937_v55 = vpop.f32.mrf.mxu1  ;;  %v2078_v43 = vpop.f32.mrf.mxu0 }
 0x6ee   :  { %v1938_v9 = vadd.f32 %v1937_v55, %v3205_v59  ;;  %v2079_v13 = vadd.f32 %v2078_v43, %v3205_v59  ;;  %v1970_v53 = vmax.f32 %v1946_v58, 0.0  ;;  %v2111_v57 = vmax.f32 %v2087_v4, 0.0 }
 0x6ef   :  { %v2946_v40 = vpop.f32.mrf.mxu1  ;;  %v2964_v54 = vpop.f32.mrf.mxu0 }
 0x6f0   :  { %v1949_v45 = vadd.f32 %v2946_v40, %v3211_v62  ;;  %v2090_v47 = vadd.f32 %v2964_v54, %v3211_v62  ;;  %v1968_v39 = vmax.f32 %v1938_v9, 0.0  ;;  %v2109_v44 = vmax.f32 %v2079_v13, 0.0 }
 0x6f1   :  { %v1940_v10 = vpop.f32.mrf.mxu1  ;;  %v2081_v25 = vpop.f32.mrf.mxu0 }
 0x6f2   :  { %v1971_v14 = vmax.f32 %v1949_v45, 0.0  ;;  %v2112_v18 = vmax.f32 %v2090_v47, 0.0  ;;  %v1941_v17 = vadd.f32 %v1940_v10, %v3207_v60  ;;  %v2082_v37 = vadd.f32 %v2081_v25, %v3207_v60 }
 0x6f3   :  { %v2949_v22 = vpop.f32.mrf.mxu1  ;;  %v2967_v27 = vpop.f32.mrf.mxu0 }
 0x6f4   :  { %v1977_v36 = vpack.c.bf16 %v1971_v14, %v1970_v53  ;;  %v3811_v23 = vpack.c.bf16 %v2112_v18, %v2111_v57  ;;  %v1969_v0 = vmax.f32 %v1941_v17, 0.0  ;;  %v2110_v35 = vmax.f32 %v2082_v37, 0.0 }
 0x6f5   :  { %v1962_v48 = vadd.f32 %v2949_v22, %v3225_v31  ;;  %v1953_v5 = vpop.f32.mrf.mxu1  ;;  %v2094_v52 = vpop.f32.mrf.mxu0  ;;  %v2103_v15 = vadd.f32 %v2967_v27, %v3225_v31 }
 0x6f6   :  { %v3817_v6 = vmax.bf16 %v1977_v36, %v1840_v16  ;;  %v1976_v49 = vpack.c.bf16 %v1969_v0, %v1968_v39  ;;  %v3819_v3 = vpack.c.bf16 %v2110_v35, %v2109_v44  ;;  %v1954_v1 = vadd.f32 %v1953_v5, %v3215_v7 }
 0x6f7   :  { %v2950_v29 = vpop.f32.mrf.mxu1  ;;  %v2968_v38 = vpop.f32.mrf.mxu0  ;;  %v2095_v19 = vadd.f32 %v2094_v52, %v3215_v7  ;;  %v1974_v16 = vmax.f32 %v1962_v48, 0.0  ;;  %v2115_v24 = vmax.f32 %v2103_v15, 0.0 }
 0x6f8   :  { %v2122_v50 = vmax.bf16 %v3811_v23, %v3817_v6  ;;  %v3828_v58 = vmax.bf16 %v1976_v49, %v1839_v2  ;;  %v1965_v26 = vadd.f32 %v2950_v29, %v3233_v41  ;;  %v2106_v4 = vadd.f32 %v2968_v38, %v3233_v41 }
 0x6f9   :  { %v1956_v55 = vpop.f32.mrf.mxu1  ;;  %v2097_v43 = vpop.f32.mrf.mxu0  ;;  %v1972_v11 = vmax.f32 %v1954_v1, 0.0  ;;  %v2113_v53 = vmax.f32 %v2095_v19, 0.0 }
 0x6fa   :  { %v2121_v9 = vmax.bf16 %v3819_v3, %v3828_v58  ;;  %v1975_v13 = vmax.f32 %v1965_v26, 0.0  ;;  %v1957_v40 = vadd.f32 %v1956_v55, %v3219_v12  ;;  %v2098_v54 = vadd.f32 %v2097_v43, %v3219_v12 }
 0x6fb   :  { %v2116_v2 = vmax.f32 %v2106_v4, 0.0  ;;  %v2973_v45 = vpop.f32.mrf.mxu1  ;;  %v2991_v47 = vpop.f32.mrf.mxu0 }
 0x6fc   :  { %v1979_v57 = vpack.c.bf16 %v1975_v13, %v1974_v16  ;;  %v1973_v10 = vmax.f32 %v1957_v40, 0.0  ;;  %v2114_v25 = vmax.f32 %v2098_v54, 0.0  ;;  %v2173_v18 = vadd.f32 %v2973_v45, %v3140_v20 }
 0x6fd   :  { %v3837_v14 = vpack.c.bf16 %v2116_v2, %v2115_v24  ;;  %v2314_v17 = vadd.f32 %v2991_v47, %v3140_v20  ;;  %v2164_v37 = vpop.f32.mrf.mxu1  ;;  %v2305_v39 = vpop.f32.mrf.mxu0 }
 0x6fe   :  { %v3844_v44 = vmax.bf16 %v1979_v57, %v1842_v42  ;;  %v1978_v22 = vpack.c.bf16 %v1973_v10, %v1972_v11  ;;  %v3846_v27 = vpack.c.bf16 %v2114_v25, %v2113_v53  ;;  %v2165_v36 = vadd.f32 %v2164_v37, %v3142_v21 }
 0x6ff   :  { %v2974_v0 = vpop.f32.mrf.mxu1  ;;  %v2992_v35 = vpop.f32.mrf.mxu0  ;;  %v2181_v32 = vmax.f32 %v2173_v18, 0.0  ;;  %v2322_v42 = vmax.f32 %v2314_v17, 0.0  ;;  %v2306_v52 = vadd.f32 %v2305_v39, %v3142_v21 }
 0x700   :  { %v2124_v48 = vmax.bf16 %v3837_v14, %v3844_v44  ;;  %v3854_v20 = vmax.bf16 %v1978_v22, %v1841_v30  ;;  %v2176_v5 = vadd.f32 %v2974_v0, %v3146_v28  ;;  %v2317_v8 = vadd.f32 %v2992_v35, %v3146_v28 }
 0x701   :  { %v2167_v49 = vpop.f32.mrf.mxu1  ;;  %v2308_v15 = vpop.f32.mrf.mxu0  ;;  %v2179_v63 = vmax.f32 %v2165_v36, 0.0  ;;  %v2320_v28 = vmax.f32 %v2306_v52, 0.0 }
 0x702   :  { %v2123_v1 = vmax.bf16 %v3846_v27, %v3854_v20  ;;  %v2182_v29 = vmax.f32 %v2176_v5, 0.0  ;;  %v2323_v38 = vmax.f32 %v2317_v8, 0.0  ;;  %v2168_v19 = vadd.f32 %v2167_v49, %v3150_v33 }
 0x703   :  { %v2309_v46 = vadd.f32 %v2308_v15, %v3150_v33 }
 0x704   :  { %v2184_v30 = vpack.c.bf16 %v2182_v29, %v2181_v32  ;;  %v2325_v26 = vpack.c.bf16 %v2323_v38, %v2322_v42  ;;  %v2180_v16 = vmax.f32 %v2168_v19, 0.0 }
 0x705   :  { %v2321_v4 = vmax.f32 %v2309_v46, 0.0 }
 0x706   :  { %v2183_v55 = vpack.c.bf16 %v2180_v16, %v2179_v63  ;;  %2975 = vmatprep.subr.bf16.mxu1 %v2184_v30  ;;  %2993 = vmatprep.subr.bf16.mxu0 %v2325_v26 }
 0x707   :  { %v2324_v21 = vpack.c.bf16 %v2321_v4, %v2320_v28  ;;  %2976 = vmatpush3.bf16.msra.mxu1 %v2184_v30  ;;  %2994 = vmatpush3.bf16.msra.mxu0 %v2325_v26 }
 0x708   :  { %2977 = vmatprep.subr.bf16.mxu1 %v2183_v55 }
 0x709   :  { %2995 = vmatprep.subr.bf16.mxu0 %v2324_v21 }
 0x70b   :  { %2978 = vmatpush3.bf16.msra.mxu1 %v2183_v55  ;;  %2996 = vmatpush3.bf16.msra.mxu0 %v2324_v21 }
 0x70e   :  { %2980 = vmatmul.mubr.msk.bf16.vlgmr.msra.gmra.mxu1 %vm202_vm2, %v3673_v51  ;;  %2998 = vmatmul.mubr.msk.bf16.vlgmr.msra.gmra.mxu0 %vm202_vm2, %v3673_v51 }
 0x70f   :  { %2983 = vmatprep.mubr.msk.bf16.mxu1 %vm202_vm2, %v3682_v56  ;;  %3001 = vmatprep.mubr.msk.bf16.mxu0 %vm202_vm2, %v3682_v56 }
 0x716   :  { %2984 = vmatmul.mubr.msk.bf16.gmra.mxu1 %vm202_vm2, %v3691_v34  ;;  %3002 = vmatmul.mubr.msk.bf16.gmra.mxu0 %vm202_vm2, %v3691_v34 }
 0x7ce   :  { %v2981_v33 = vpop.f32.mrf.mxu1  ;;  %v2999_v43 = vpop.f32.mrf.mxu0 }
 0x7cf   :  { %v2228_v13 = vadd.f32 %v2981_v33, %v3209_v61  ;;  %v2369_v51 = vadd.f32 %v2999_v43, %v3209_v61 }
 0x7d0   :  { %v2219_v40 = vpop.f32.mrf.mxu1  ;;  %v2360_v54 = vpop.f32.mrf.mxu0 }
 0x7d1   :  { %v2220_v2 = vadd.f32 %v2219_v40, %v3205_v59  ;;  %v2252_v47 = vmax.f32 %v2228_v13, 0.0  ;;  %v2361_v53 = vadd.f32 %v2360_v54, %v3205_v59  ;;  %v2393_v61 = vmax.f32 %v2369_v51, 0.0 }
 0x7d2   :  { %v2982_v24 = vpop.f32.mrf.mxu1  ;;  %v3000_v11 = vpop.f32.mrf.mxu0 }
 0x7d3   :  { %v2231_v56 = vadd.f32 %v2982_v24, %v3211_v62  ;;  %v2372_v45 = vadd.f32 %v3000_v11, %v3211_v62  ;;  %v2250_v22 = vmax.f32 %v2220_v2, 0.0  ;;  %v2391_v59 = vmax.f32 %v2361_v53, 0.0 }
 0x7d4   :  { %v2222_v34 = vpop.f32.mrf.mxu1  ;;  %v2363_v57 = vpop.f32.mrf.mxu0 }
 0x7d5   :  { %v2253_v10 = vmax.f32 %v2231_v56, 0.0  ;;  %v2394_v25 = vmax.f32 %v2372_v45, 0.0  ;;  %v2223_v18 = vadd.f32 %v2222_v34, %v3207_v60  ;;  %v2364_v17 = vadd.f32 %v2363_v57, %v3207_v60 }
 0x7d6   :  { %v2985_v37 = vpop.f32.mrf.mxu1  ;;  %v3003_v39 = vpop.f32.mrf.mxu0 }
 0x7d7   :  { %v2259_v36 = vpack.c.bf16 %v2253_v10, %v2252_v47  ;;  %v2251_v0 = vmax.f32 %v2223_v18, 0.0  ;;  %v2392_v35 = vmax.f32 %v2364_v17, 0.0  ;;  %v2244_v62 = vadd.f32 %v2985_v37, %v3225_v31 }
 0x7d8   :  { %v2235_v5 = vpop.f32.mrf.mxu1  ;;  %v2376_v8 = vpop.f32.mrf.mxu0  ;;  %v2400_v42 = vpack.c.bf16 %v2394_v25, %v2393_v61  ;;  %v2385_v60 = vadd.f32 %v3003_v39, %v3225_v31 }
 0x7d9   :  { %v2263_v32 = vmax.bf16 %v2259_v36, %v2122_v50  ;;  %v2258_v52 = vpack.c.bf16 %v2251_v0, %v2250_v22  ;;  %v2399_v19 = vpack.c.bf16 %v2392_v35, %v2391_v59  ;;  %v2256_v63 = vmax.f32 %v2244_v62, 0.0 }
 0x7da   :  { %v2986_v49 = vpop.f32.mrf.mxu1  ;;  %v3004_v15 = vpop.f32.mrf.mxu0  ;;  %v2236_v30 = vadd.f32 %v2235_v5, %v3215_v7  ;;  %v2377_v4 = vadd.f32 %v2376_v8, %v3215_v7  ;;  %v2397_v21 = vmax.f32 %v2385_v60, 0.0 }
 0x7db   :  { %v2404_v29 = vmax.bf16 %v2400_v42, %v2263_v32  ;;  %v2262_v38 = vmax.bf16 %v2258_v52, %v2121_v9  ;;  %v2247_v46 = vadd.f32 %v2986_v49, %v3233_v41  ;;  %v2388_v23 = vadd.f32 %v3004_v15, %v3233_v41 }
 0x7dc   :  { %v2238_v6 = vpop.f32.mrf.mxu1  ;;  %v2379_v50 = vpop.f32.mrf.mxu0  ;;  %v2254_v7 = vmax.f32 %v2236_v30, 0.0  ;;  %v2395_v54 = vmax.f32 %v2377_v4, 0.0 }
 0x7dd   :  { %v2567_v26 = vcombine.low %v2404_v29, %v2404_v29  ;;  %v2568_v31 = vcombine.high %v2404_v29, %v2404_v29  ;;  %v2403_v16 = vmax.bf16 %v2399_v19, %v2262_v38  ;;  %v2257_v28 = vmax.f32 %v2247_v46, 0.0 }
 0x7de   :  { %v2398_v55 = vmax.f32 %v2388_v23, 0.0  ;;  %v2239_v3 = vadd.f32 %v2238_v6, %v3219_v12  ;;  %v2380_v58 = vadd.f32 %v2379_v50, %v3219_v12 }
 0x7df   :  { %2438 = vst.msk [vmem:[%s3940_s5 + $0x8] sm:$0xf] %vm2435_vm3, %v2567_v26  ;;  %2439 = vst.msk [vmem:[%s3940_s5 + $0xc] sm:$0xf] %vm2435_vm3, %v2568_v31  ;;  %v2565_v41 = vcombine.low %v2403_v16, %v2403_v16  ;;  %v2566_v9 = vcombine.high %v2403_v16, %v2403_v16  ;;  %v2261_v33 = vpack.c.bf16 %v2257_v28, %v2256_v63 }
 0x7e0   :  { %v2255_v43 = vmax.f32 %v2239_v3, 0.0  ;;  %v2396_v13 = vmax.f32 %v2380_v58, 0.0  ;;  %v2402_v40 = vpack.c.bf16 %v2398_v55, %v2397_v21 }
 0x7e1   :  { %2436 = vst.msk [vmem:[%s3940_s5] sm:$0xf] %vm2435_vm3, %v2565_v41  ;;  %2437 = vst.msk [vmem:[%s3940_s5 + $0x4] sm:$0xf] %vm2435_vm3, %v2566_v9  ;;  %v2265_v12 = vmax.bf16 %v2261_v33, %v2124_v48 }
 0x7e2   :  { %v2260_v51 = vpack.c.bf16 %v2255_v43, %v2254_v7  ;;  %v2401_v2 = vpack.c.bf16 %v2396_v13, %v2395_v54 }
 0x7e3   :  { %v2406_v24 = vmax.bf16 %v2402_v40, %v2265_v12 }
 0x7e4   :  { %v2264_v11 = vmax.bf16 %v2260_v51, %v2123_v1 }
 0x7e5   :  { %v2571_v56 = vcombine.low %v2406_v24, %v2406_v24  ;;  %v2572_v45 = vcombine.high %v2406_v24, %v2406_v24 }
 0x7e6   :  { %v2405_v47 = vmax.bf16 %v2401_v2, %v2264_v11 }
 0x7e7   :  { %2442 = vst.msk [vmem:[%s3940_s5 + $0x18] sm:$0xf] %vm2435_vm3, %v2571_v56  ;;  %2443 = vst.msk [vmem:[%s3940_s5 + $0x1c] sm:$0xf] %vm2435_vm3, %v2572_v45 }
 0x7e8   :  { %v2569_v14 = vcombine.low %v2405_v47, %v2405_v47  ;;  %v2570_v44 = vcombine.high %v2405_v47, %v2405_v47 }
 0x7ea   :  { %2440 = vst.msk [vmem:[%s3940_s5 + $0x10] sm:$0xf] %vm2435_vm3, %v2569_v14  ;;  %2441 = vst.msk [vmem:[%s3940_s5 + $0x14] sm:$0xf] %vm2435_vm3, %v2570_v44 }

</bundles_post_ra>
